<compile_context>
chip_gen: v7x
topology: tpu7x:2x2x1
jax: 0.10.0
libtpu: 0.0.40
codegen_flags: <defaults>
</compile_context>

<pallas_src>
import jax
import jax.numpy as jnp
from jax.experimental import pallas as pl
from jax.experimental.pallas import tpu as pltpu

# ---------------- problem sizes (small, consistent with the module) ----------------
N_NODES = 32           # nodes per mini-batch (4 graphs x 8 nodes)
N_GRAPHS = 4
NODES_PER_GRAPH = 8
G_PAD = 8              # pooled rows padded to a full sublane tile
IN_CHANNELS = 16       # float node features -> Linear encoder branch of forward()
IN_AUG = IN_CHANNELS + 1   # [x | 1] for the encoder-bias fold
HIDDEN = 128
H2 = 2 * HIDDEN        # both branches fused along the feature axis
OUT_CHANNELS = 8
OUT_PAD = 128          # classifier padded to lane width
BN_EPS = 1e-5


# ---------------- Pallas kernel: per-batch forward hot path ----------------
def gnn_graph_kernel(x_ref, ah_ref, w0_ref, b0_ref, w1_ref, b1_ref,
                     w2_ref, b2_ref, w3_ref, b3_ref, wo_ref, bo_ref,
                     clf_w_ref, clf_b_ref, out_ref):
    f32 = jnp.float32
    bf16 = jnp.bfloat16
    A = ah_ref[...]                                                      # [N, N] bf16 (I + A)

    # layer-0 GIN aggregation directly on augmented raw features (encoder folded into w0)
    agg0x = jnp.dot(A, x_ref[...], preferred_element_type=f32).astype(bf16)        # [N, 17]

    # conv0 MLP, both branches fused on the feature axis (encoder + BN folded into w0/b0)
    z0 = jnp.maximum(jnp.dot(agg0x, w0_ref[...], preferred_element_type=f32)
                     + b0_ref[...], 0.0).astype(bf16)                              # [N, 2H]
    h0 = jnp.dot(z0, w1_ref[...], preferred_element_type=f32) + b1_ref[...]
    # GIN_Net inter-layer relu (dropout p=0.0 is identity in eval mode)
    h0 = jnp.maximum(h0, 0.0).astype(bf16)                                          # [N, 2H]

    # layer-1 aggregation for both branches in one MXU push
    agg1 = jnp.dot(A, h0, preferred_element_type=f32).astype(bf16)                  # [N, 2H]

    # conv1 MLP (block-diagonal weights; BN folded into w2/b2)
    z1 = jnp.maximum(jnp.dot(agg1, w2_ref[...], preferred_element_type=f32)
                     + b2_ref[...], 0.0).astype(bf16)                               # [N, 2H]
    h1 = jnp.dot(z1, w3_ref[...], preferred_element_type=f32) + b3_ref[...]         # [N, 2H] f32

    # global_add_pool: contiguous fixed-size graphs -> reshape + sublane-sum (off the MXU);
    # zero-pad graphs 4..7 so the tail matmuls / final store are (8, lane)-tile aligned
    pooled = jnp.sum(h1.reshape(N_GRAPHS, NODES_PER_GRAPH, H2), axis=1)             # [G, 2H]
    pooled = jnp.concatenate(
        [pooled, jnp.zeros((G_PAD - N_GRAPHS, H2), f32)], axis=0).astype(bf16)      # [G_PAD, 2H]

    # local/global linear_out1 + relu (block-diagonal), then branch-sum + clf in one matmul:
    # clf_w_ref = vstack([clf_w, clf_w]) (zero-padded to 128 lanes), so
    # o1 @ clf_w_ref == (o_local + o_global) @ clf_w
    o1 = jnp.maximum(jnp.dot(pooled, wo_ref[...], preferred_element_type=f32)
                     + bo_ref[...], 0.0).astype(bf16)                               # [G_PAD, 2H]
    out_ref[...] = (jnp.dot(o1, clf_w_ref[...], preferred_element_type=f32)
                    + clf_b_ref[...])                                               # [G_PAD, 128]


@jax.jit
def gnn_forward(x_aug, a_hat, w0, b0, w1, b1, w2, b2, w3, b3, wo, bo, clf_w, clf_b):
    B = x_aug.shape[0]

    def batch_spec(shape):
        # per-batch operand: leading batch dim squeezed, block index follows the grid
        return pl.BlockSpec((None,) + shape, lambda b: (b,) + (0,) * len(shape))

    def resident_spec(shape):
        # weight/bias: constant block index -> DMA'd once, stays VMEM-resident
        return pl.BlockSpec(shape, lambda b: (0,) * len(shape))

    weights = (w0, b0, w1, b1, w2, b2, w3, b3, wo, bo, clf_w, clf_b)

    flops_per_batch = 2 * (N_NODES * N_NODES * IN_AUG       # A @ x_aug
                           + N_NODES * IN_AUG * H2          # agg0x @ W0'
                           + N_NODES * H2 * H2              # z0 @ w1
                           + N_NODES * N_NODES * H2         # A @ h0
                           + N_NODES * H2 * H2              # agg1 @ w2
                           + N_NODES * H2 * H2              # z1 @ w3
                           + G_PAD * H2 * H2                # pooled @ wo
                           + G_PAD * H2 * OUT_PAD)          # o1 @ clf
    bytes_accessed = int(sum(w.size * w.dtype.itemsize for w in weights)
                         + x_aug.size * x_aug.dtype.itemsize
                         + a_hat.size * a_hat.dtype.itemsize
                         + B * G_PAD * OUT_PAD * 4)
    cost = pl.CostEstimate(flops=B * flops_per_batch, transcendentals=0,
                           bytes_accessed=bytes_accessed)

    return pl.pallas_call(
        gnn_graph_kernel,
        out_shape=jax.ShapeDtypeStruct((B, G_PAD, OUT_PAD), jnp.float32),
        grid=(B,),
        in_specs=[batch_spec((N_NODES, IN_AUG)),
                  batch_spec((N_NODES, N_NODES))]
                 + [resident_spec(w.shape) for w in weights],
        out_specs=batch_spec((G_PAD, OUT_PAD)),
        compiler_params=pltpu.CompilerParams(dimension_semantics=("parallel",)),
        cost_estimate=cost,
    )(x_aug, a_hat, *weights)


# ---------------- plain-JAX reference (original, unfused math) ----------------
def reference_forward(x, adj, pool, enc_w, enc_b, w_stack, b_stack, bn_stack, clf_w, clf_b):
    h = x @ enc_w + enc_b

    def gin_conv(h, widx, bnidx):
        agg = h + adj @ h
        z = agg @ w_stack[widx] + b_stack[widx]
        g, bt, m, v = bn_stack[bnidx, 0], bn_stack[bnidx, 1], bn_stack[bnidx, 2], bn_stack[bnidx, 3]
        z = (z - m) / jnp.sqrt(v + BN_EPS) * g + bt
        z = jnp.maximum(z, 0.0)
        return z @ w_stack[widx + 1] + b_stack[widx + 1]

    def gin_net(h, bw, bb):
        h1 = jnp.maximum(gin_conv(h, bw + 0, bb + 0), 0.0)
        return gin_conv(h1, bw + 2, bb + 1)

    xl = pool @ gin_net(h, 0, 0)
    xg = pool @ gin_net(h, 4, 2)
    xl = jnp.maximum(xl @ w_stack[8] + b_stack[8], 0.0)
    xg = jnp.maximum(xg @ w_stack[9] + b_stack[9], 0.0)
    return (xl + xg) @ clf_w + clf_b


# ------------- host-side parameter fusion (encoder fold + BN fold + branch fusion) ----------
def _fold_bn(w, b, bn):
    # y = BN(x @ w + b) in eval mode  ==  x @ (w * s) + ((b - mean) * s + beta)
    gamma, beta, mean, var = bn[0], bn[1], bn[2], bn[3]        # each [1, H]
    s = gamma / jnp.sqrt(var + BN_EPS)
    return w * s, (b - mean) * s + beta


def _block_diag(a, b):
    top = jnp.concatenate([a, jnp.zeros((a.shape[0], b.shape[1]), a.dtype)], axis=1)
    bot = jnp.concatenate([jnp.zeros((b.shape[0], a.shape[1]), a.dtype), b], axis=1)
    return jnp.concatenate([top, bot], axis=0)


def fuse_params(enc_w, enc_b, w_stack, b_stack, bn_stack, clf_w, clf_b):
    bf16 = jnp.bfloat16
    # local GIN: weights 0..3 / BN 0..1 ; global GIN: weights 4..7 / BN 2..3
    wl0, bl0 = _fold_bn(w_stack[0], b_stack[0], bn_stack[0])
    wg0, bg0 = _fold_bn(w_stack[4], b_stack[4], bn_stack[2])
    wl2, bl2 = _fold_bn(w_stack[2], b_stack[2], bn_stack[1])
    wg2, bg2 = _fold_bn(w_stack[6], b_stack[6], bn_stack[3])

    w0 = jnp.concatenate([wl0, wg0], axis=1)                    # [H, 2H]
    b0 = jnp.concatenate([bl0, bg0], axis=1)                    # [1, 2H]
    # encoder fold: A @ (x @ enc_w + enc_b) == (A @ [x | 1]) @ vstack([enc_w, enc_b]),
    # so conv0's first Linear becomes  [x | 1]-aggregate @ (vstack([enc_w, enc_b]) @ w0)
    enc_stack = jnp.concatenate([enc_w, enc_b], axis=0)         # [IN+1, H]
    w0p = enc_stack @ w0                                        # [IN+1, 2H]

    w1 = _block_diag(w_stack[1], w_stack[5])                    # [2H, 2H]
    b1 = jnp.concatenate([b_stack[1], b_stack[5]], axis=1)
    w2 = _block_diag(wl2, wg2)
    b2 = jnp.concatenate([bl2, bg2], axis=1)
    w3 = _block_diag(w_stack[3], w_stack[7])
    b3 = jnp.concatenate([b_stack[3], b_stack[7]], axis=1)
    wo = _block_diag(w_stack[8], w_stack[9])                    # local/global linear_out1
    bo = jnp.concatenate([b_stack[8], b_stack[9]], axis=1)

    # branch-sum + clf fused: o1 @ vstack([clf_w, clf_w]); zero-pad to 128 lanes
    clf2 = jnp.concatenate([clf_w, clf_w], axis=0)              # [2H, OUT]
    clf2 = jnp.pad(clf2, ((0, 0), (0, OUT_PAD - OUT_CHANNELS)))     # [2H, 128]
    clf_b_pad = jnp.pad(clf_b, ((0, 0), (0, OUT_PAD - OUT_CHANNELS)))  # [1, 128]

    return (w0p.astype(bf16), b0, w1.astype(bf16), b1,
            w2.astype(bf16), b2, w3.astype(bf16), b3,
            wo.astype(bf16), bo, clf2.astype(bf16), clf_b_pad)


# ---------------- parameter / input construction ----------------
def uniform_init(key, shape, fan_in):
    bound = 1.0 / jnp.sqrt(jnp.float32(fan_in))
    return jax.random.uniform(key, shape, jnp.float32, -bound, bound)


def build_params(key):
    keys = jax.random.split(key, 32)
    ki = iter(keys)

    enc_w = uniform_init(next(ki), (IN_CHANNELS, HIDDEN), IN_CHANNELS)
    enc_b = uniform_init(next(ki), (1, HIDDEN), IN_CHANNELS)

    # 10 [H, H] weight matrices:
    #   0..3: local GIN (layer0 lin1, layer0 lin2, layer1 lin1, layer1 lin2)
    #   4..7: global GIN (same order)
    #   8: local_linear_out1, 9: global_linear_out1
    w_list, b_list = [], []
    for _ in range(10):
        w_list.append(uniform_init(next(ki), (HIDDEN, HIDDEN), HIDDEN))
        b_list.append(uniform_init(next(ki), (1, HIDDEN), HIDDEN))
    w_stack = jnp.stack(w_list)                     # [10, H, H]
    b_stack = jnp.stack(b_list)                     # [10, 1, H]

    # 4 eval-mode BatchNorm1d layers with NON-trivial running stats / affine params so the
    # host-side BN fold is numerically validated (not just the gamma=1/var=1/mean=0 case)
    bn_list = []
    for _ in range(4):
        kg, kb, km, kv = jax.random.split(next(ki), 4)
        gamma = jax.random.uniform(kg, (1, HIDDEN), jnp.float32, 0.8, 1.2)
        beta = jax.random.uniform(kb, (1, HIDDEN), jnp.float32, -0.2, 0.2)
        rmean = jax.random.uniform(km, (1, HIDDEN), jnp.float32, -0.2, 0.2)
        rvar = jax.random.uniform(kv, (1, HIDDEN), jnp.float32, 0.8, 1.25)
        bn_list.append(jnp.stack([gamma, beta, rmean, rvar]))
    bn_stack = jnp.stack(bn_list)                   # [4, 4, 1, H]

    clf_w = uniform_init(next(ki), (HIDDEN, OUT_CHANNELS), HIDDEN)
    clf_b = uniform_init(next(ki), (1, OUT_CHANNELS), HIDDEN)
    return enc_w, enc_b, w_stack, b_stack, bn_stack, clf_w, clf_b


def build_graph_batch(key):
    kx, ke = jax.random.split(key, 2)
    # float node features -> the Linear encoder branch of forward()
    # TODO(synk): integer-feature AtomEncoder (embedding-sum) branch not implemented.
    x = jax.random.normal(kx, (N_NODES, IN_CHANNELS), jnp.float32)

    # random edges within each graph (undirected -> both directions)
    edges_src, edges_dst = [], []
    ekeys = jax.random.split(ke, N_GRAPHS)
    for g in range(N_GRAPHS):
        base = g * NODES_PER_GRAPH
        pairs = jax.random.randint(ekeys[g], (12, 2), 0, NODES_PER_GRAPH) + base
        src, dst = pairs[:, 0], pairs[:, 1]
        edges_src.append(jnp.concatenate([src, dst]))
        edges_dst.append(jnp.concatenate([dst, src]))
    src = jnp.concatenate(edges_src)
    dst = jnp.concatenate(edges_dst)

    # dense adjacency for sum-aggregation: A[dst, src] += 1
    adj = jnp.zeros((N_NODES, N_NODES), jnp.float32).at[dst, src].add(1.0)
    return x, adj


if __name__ == "__main__":
    key = jax.random.PRNGKey(0)
    k_graph, k_params = jax.random.split(key)

    # B independent 32-node mini-batches, all processed by a single pallas_call (batch grid)
    B = 8
    gkeys = jax.random.split(k_graph, B)
    xs, adjs = zip(*[build_graph_batch(k) for k in gkeys])
    x = jnp.stack(xs)                                # [B, N, 16]
    adj = jnp.stack(adjs)                            # [B, N, N]

    enc_w, enc_b, w_stack, b_stack, bn_stack, clf_w, clf_b = build_params(k_params)

    # one-time host-side fusion: encoder fold, BN fold, branch concat/block-diag, padding, bf16
    fused = fuse_params(enc_w, enc_b, w_stack, b_stack, bn_stack, clf_w, clf_b)

    a_hat = (jnp.eye(N_NODES, dtype=jnp.float32)[None] + adj).astype(jnp.bfloat16)   # [B, N, N]
    ones = jnp.ones((B, N_NODES, 1), jnp.float32)
    x_aug = jnp.concatenate([x, ones], axis=-1).astype(jnp.bfloat16)                 # [B, N, 17]

    out_pad = gnn_forward(x_aug, a_hat, *fused)
    out_pad = jax.block_until_ready(out_pad)
    out = out_pad[:, :N_GRAPHS, :OUT_CHANNELS]                                       # [B, G, OUT]

    # plain-JAX f32 reference over the batch
    batch_vec = jnp.repeat(jnp.arange(N_GRAPHS), NODES_PER_GRAPH)
    pool = (batch_vec[None, :] == jnp.arange(N_GRAPHS)[:, None]).astype(jnp.float32)  # [G, N]
    ref = jax.vmap(lambda xb, ab: reference_forward(
        xb, ab, pool, enc_w, enc_b, w_stack, b_stack, bn_stack, clf_w, clf_b))(x, adj)

    assert out.shape == (B, N_GRAPHS, OUT_CHANNELS)
    # bf16 operands (f32 accumulation) vs. the all-f32 reference -> relaxed tolerance
    assert jnp.allclose(out, ref, atol=1e-1, rtol=5e-2), "Pallas kernel mismatch vs reference"

    print("KERNEL_OK")
</pallas_src>

<mosaic_0001>
module attributes {stable_mosaic.version = 11 : i64} {
  func.func @gnn_graph_kernel(%arg0: i32, %arg1: memref<1x32x17xbf16, #tpu.memory_space<vmem>>, %arg2: memref<1x32x32xbf16, #tpu.memory_space<vmem>>, %arg3: memref<17x256xbf16, #tpu.memory_space<vmem>>, %arg4: memref<1x256xf32, #tpu.memory_space<vmem>>, %arg5: memref<256x256xbf16, #tpu.memory_space<vmem>>, %arg6: memref<1x256xf32, #tpu.memory_space<vmem>>, %arg7: memref<256x256xbf16, #tpu.memory_space<vmem>>, %arg8: memref<1x256xf32, #tpu.memory_space<vmem>>, %arg9: memref<256x256xbf16, #tpu.memory_space<vmem>>, %arg10: memref<1x256xf32, #tpu.memory_space<vmem>>, %arg11: memref<256x256xbf16, #tpu.memory_space<vmem>>, %arg12: memref<1x256xf32, #tpu.memory_space<vmem>>, %arg13: memref<256x128xbf16, #tpu.memory_space<vmem>>, %arg14: memref<1x128xf32, #tpu.memory_space<vmem>>, %arg15: memref<1x8x128xf32, #tpu.memory_space<vmem>>) attributes {dimension_semantics = [#tpu.dimension_semantics<parallel>], iteration_bounds = array<i64: 8>, scalar_prefetch = 0 : i64, scratch_operands = 0 : i64, tpu.core_type = #tpu.core_type<tc>, window_params = [{transform_indices = @transform_0, window_bounds = array<i64: 1, 32, 17>}, {transform_indices = @transform_1, window_bounds = array<i64: 1, 32, 32>}, {pipeline_mode = #tpu.pipeline_mode<synchronous>, transform_indices = @transform_2, window_bounds = array<i64: 17, 256>}, {pipeline_mode = #tpu.pipeline_mode<synchronous>, transform_indices = @transform_3, window_bounds = array<i64: 1, 256>}, {pipeline_mode = #tpu.pipeline_mode<synchronous>, transform_indices = @transform_4, window_bounds = array<i64: 256, 256>}, {pipeline_mode = #tpu.pipeline_mode<synchronous>, transform_indices = @transform_5, window_bounds = array<i64: 1, 256>}, {pipeline_mode = #tpu.pipeline_mode<synchronous>, transform_indices = @transform_6, window_bounds = array<i64: 256, 256>}, {pipeline_mode = #tpu.pipeline_mode<synchronous>, transform_indices = @transform_7, window_bounds = array<i64: 1, 256>}, {pipeline_mode = #tpu.pipeline_mode<synchronous>, transform_indices = @transform_8, window_bounds = array<i64: 256, 256>}, {pipeline_mode = #tpu.pipeline_mode<synchronous>, transform_indices = @transform_9, window_bounds = array<i64: 1, 256>}, {pipeline_mode = #tpu.pipeline_mode<synchronous>, transform_indices = @transform_10, window_bounds = array<i64: 256, 256>}, {pipeline_mode = #tpu.pipeline_mode<synchronous>, transform_indices = @transform_11, window_bounds = array<i64: 1, 256>}, {pipeline_mode = #tpu.pipeline_mode<synchronous>, transform_indices = @transform_12, window_bounds = array<i64: 256, 128>}, {pipeline_mode = #tpu.pipeline_mode<synchronous>, transform_indices = @transform_13, window_bounds = array<i64: 1, 128>}, {transform_indices = @transform_14, window_bounds = array<i64: 1, 8, 128>}]} {
    %c0 = arith.constant 0 : index
    %c0_0 = arith.constant 0 : index
    %c0_1 = arith.constant 0 : index
    %0 = vector.load %arg2[%c0, %c0_0, %c0_1] : memref<1x32x32xbf16, #tpu.memory_space<vmem>>, vector<1x32x32xbf16>
    %1 = vector.shape_cast %0 : vector<1x32x32xbf16> to vector<32x32xbf16>
    %c0_2 = arith.constant 0 : index
    %c0_3 = arith.constant 0 : index
    %c0_4 = arith.constant 0 : index
    %2 = vector.load %arg1[%c0_2, %c0_3, %c0_4] : memref<1x32x17xbf16, #tpu.memory_space<vmem>>, vector<1x32x17xbf16>
    %3 = vector.shape_cast %2 : vector<1x32x17xbf16> to vector<32x17xbf16>
    %cst = arith.constant dense<0.000000e+00> : vector<32x17xf32>
    %4 = tpu.matmul %1, %3, %cst {dimension_numbers = #tpu.dot_dimension_numbers<[1], [0], [0], [1], [0, 0, 1, 1], [], []>} : vector<32x32xbf16>, vector<32x17xbf16>, vector<32x17xf32> -> vector<32x17xf32>
    %5 = arith.truncf %4 : vector<32x17xf32> to vector<32x17xbf16>
    %c0_5 = arith.constant 0 : index
    %c0_6 = arith.constant 0 : index
    %6 = vector.load %arg3[%c0_5, %c0_6] : memref<17x256xbf16, #tpu.memory_space<vmem>>, vector<17x256xbf16>
    %cst_7 = arith.constant dense<0.000000e+00> : vector<32x256xf32>
    %7 = tpu.matmul %5, %6, %cst_7 {dimension_numbers = #tpu.dot_dimension_numbers<[1], [0], [0], [1], [0, 0, 1, 1], [], []>} : vector<32x17xbf16>, vector<17x256xbf16>, vector<32x256xf32> -> vector<32x256xf32>
    %c0_8 = arith.constant 0 : index
    %c0_9 = arith.constant 0 : index
    %8 = vector.load %arg4[%c0_8, %c0_9] : memref<1x256xf32, #tpu.memory_space<vmem>>, vector<1x256xf32>
    %9 = vector.broadcast %8 : vector<1x256xf32> to vector<32x256xf32>
    %10 = arith.addf %7, %9 : vector<32x256xf32>
    %cst_10 = arith.constant 0.000000e+00 : f32
    %11 = vector.broadcast %cst_10 : f32 to vector<32x256xf32>
    %12 = arith.maximumf %10, %11 : vector<32x256xf32>
    %13 = arith.truncf %12 : vector<32x256xf32> to vector<32x256xbf16>
    %c0_11 = arith.constant 0 : index
    %c0_12 = arith.constant 0 : index
    %14 = vector.load %arg5[%c0_11, %c0_12] : memref<256x256xbf16, #tpu.memory_space<vmem>>, vector<256x256xbf16>
    %cst_13 = arith.constant dense<0.000000e+00> : vector<32x256xf32>
    %15 = tpu.matmul %13, %14, %cst_13 {dimension_numbers = #tpu.dot_dimension_numbers<[1], [0], [0], [1], [0, 0, 1, 1], [], []>} : vector<32x256xbf16>, vector<256x256xbf16>, vector<32x256xf32> -> vector<32x256xf32>
    %c0_14 = arith.constant 0 : index
    %c0_15 = arith.constant 0 : index
    %16 = vector.load %arg6[%c0_14, %c0_15] : memref<1x256xf32, #tpu.memory_space<vmem>>, vector<1x256xf32>
    %17 = vector.broadcast %16 : vector<1x256xf32> to vector<32x256xf32>
    %18 = arith.addf %15, %17 : vector<32x256xf32>
    %cst_16 = arith.constant 0.000000e+00 : f32
    %19 = vector.broadcast %cst_16 : f32 to vector<32x256xf32>
    %20 = arith.maximumf %18, %19 : vector<32x256xf32>
    %21 = arith.truncf %20 : vector<32x256xf32> to vector<32x256xbf16>
    %cst_17 = arith.constant dense<0.000000e+00> : vector<32x256xf32>
    %22 = tpu.matmul %1, %21, %cst_17 {dimension_numbers = #tpu.dot_dimension_numbers<[1], [0], [0], [1], [0, 0, 1, 1], [], []>} : vector<32x32xbf16>, vector<32x256xbf16>, vector<32x256xf32> -> vector<32x256xf32>
    %23 = arith.truncf %22 : vector<32x256xf32> to vector<32x256xbf16>
    %c0_18 = arith.constant 0 : index
    %c0_19 = arith.constant 0 : index
    %24 = vector.load %arg7[%c0_18, %c0_19] : memref<256x256xbf16, #tpu.memory_space<vmem>>, vector<256x256xbf16>
    %cst_20 = arith.constant dense<0.000000e+00> : vector<32x256xf32>
    %25 = tpu.matmul %23, %24, %cst_20 {dimension_numbers = #tpu.dot_dimension_numbers<[1], [0], [0], [1], [0, 0, 1, 1], [], []>} : vector<32x256xbf16>, vector<256x256xbf16>, vector<32x256xf32> -> vector<32x256xf32>
    %c0_21 = arith.constant 0 : index
    %c0_22 = arith.constant 0 : index
    %26 = vector.load %arg8[%c0_21, %c0_22] : memref<1x256xf32, #tpu.memory_space<vmem>>, vector<1x256xf32>
    %27 = vector.broadcast %26 : vector<1x256xf32> to vector<32x256xf32>
    %28 = arith.addf %25, %27 : vector<32x256xf32>
    %cst_23 = arith.constant 0.000000e+00 : f32
    %29 = vector.broadcast %cst_23 : f32 to vector<32x256xf32>
    %30 = arith.maximumf %28, %29 : vector<32x256xf32>
    %31 = arith.truncf %30 : vector<32x256xf32> to vector<32x256xbf16>
    %c0_24 = arith.constant 0 : index
    %c0_25 = arith.constant 0 : index
    %32 = vector.load %arg9[%c0_24, %c0_25] : memref<256x256xbf16, #tpu.memory_space<vmem>>, vector<256x256xbf16>
    %cst_26 = arith.constant dense<0.000000e+00> : vector<32x256xf32>
    %33 = tpu.matmul %31, %32, %cst_26 {dimension_numbers = #tpu.dot_dimension_numbers<[1], [0], [0], [1], [0, 0, 1, 1], [], []>} : vector<32x256xbf16>, vector<256x256xbf16>, vector<32x256xf32> -> vector<32x256xf32>
    %c0_27 = arith.constant 0 : index
    %c0_28 = arith.constant 0 : index
    %34 = vector.load %arg10[%c0_27, %c0_28] : memref<1x256xf32, #tpu.memory_space<vmem>>, vector<1x256xf32>
    %35 = vector.broadcast %34 : vector<1x256xf32> to vector<32x256xf32>
    %36 = arith.addf %33, %35 : vector<32x256xf32>
    %37 = vector.shape_cast %36 : vector<32x256xf32> to vector<4x8x256xf32>
    %cst_29 = arith.constant dense<0.000000e+00> : vector<4x256xf32>
    %38 = vector.multi_reduction <add>, %37, %cst_29 [1] : vector<4x8x256xf32> to vector<4x256xf32>
    %cst_30 = arith.constant 0.000000e+00 : f32
    %39 = vector.broadcast %cst_30 : f32 to vector<4x256xf32>
    %40 = tpu.concatenate %38, %39 in 0 : vector<4x256xf32>, vector<4x256xf32> -> vector<8x256xf32>
    %41 = arith.truncf %40 : vector<8x256xf32> to vector<8x256xbf16>
    %c0_31 = arith.constant 0 : index
    %c0_32 = arith.constant 0 : index
    %42 = vector.load %arg11[%c0_31, %c0_32] : memref<256x256xbf16, #tpu.memory_space<vmem>>, vector<256x256xbf16>
    %cst_33 = arith.constant dense<0.000000e+00> : vector<8x256xf32>
    %43 = tpu.matmul %41, %42, %cst_33 {dimension_numbers = #tpu.dot_dimension_numbers<[1], [0], [0], [1], [0, 0, 1, 1], [], []>} : vector<8x256xbf16>, vector<256x256xbf16>, vector<8x256xf32> -> vector<8x256xf32>
    %c0_34 = arith.constant 0 : index
    %c0_35 = arith.constant 0 : index
    %44 = vector.load %arg12[%c0_34, %c0_35] : memref<1x256xf32, #tpu.memory_space<vmem>>, vector<1x256xf32>
    %45 = vector.broadcast %44 : vector<1x256xf32> to vector<8x256xf32>
    %46 = arith.addf %43, %45 : vector<8x256xf32>
    %cst_36 = arith.constant 0.000000e+00 : f32
    %47 = vector.broadcast %cst_36 : f32 to vector<8x256xf32>
    %48 = arith.maximumf %46, %47 : vector<8x256xf32>
    %49 = arith.truncf %48 : vector<8x256xf32> to vector<8x256xbf16>
    %c0_37 = arith.constant 0 : index
    %c0_38 = arith.constant 0 : index
    %50 = vector.load %arg13[%c0_37, %c0_38] : memref<256x128xbf16, #tpu.memory_space<vmem>>, vector<256x128xbf16>
    %cst_39 = arith.constant dense<0.000000e+00> : vector<8x128xf32>
    %51 = tpu.matmul %49, %50, %cst_39 {dimension_numbers = #tpu.dot_dimension_numbers<[1], [0], [0], [1], [0, 0, 1, 1], [], []>} : vector<8x256xbf16>, vector<256x128xbf16>, vector<8x128xf32> -> vector<8x128xf32>
    %c0_40 = arith.constant 0 : index
    %c0_41 = arith.constant 0 : index
    %52 = vector.load %arg14[%c0_40, %c0_41] : memref<1x128xf32, #tpu.memory_space<vmem>>, vector<1x128xf32>
    %53 = vector.broadcast %52 : vector<1x128xf32> to vector<8x128xf32>
    %54 = arith.addf %51, %53 : vector<8x128xf32>
    %c0_42 = arith.constant 0 : index
    %c0_43 = arith.constant 0 : index
    %c0_44 = arith.constant 0 : index
    %55 = vector.load %arg15[%c0_42, %c0_43, %c0_44] : memref<1x8x128xf32, #tpu.memory_space<vmem>>, vector<1x8x128xf32>
    %56 = vector.shape_cast %55 : vector<1x8x128xf32> to vector<8x128xf32>
    %57 = vector.shape_cast %54 : vector<8x128xf32> to vector<1x8x128xf32>
    tpu.vector_store %arg15[%c0_42, %c0_43, %c0_44], %57 {strides = array<i32>} : memref<1x8x128xf32, #tpu.memory_space<vmem>>, vector<1x8x128xf32>,
    return
  }
  func.func @transform_0(%arg0: i32) -> (i32, i32, i32) {
    %c0_i32 = arith.constant 0 : i32
    %c0_i32_0 = arith.constant 0 : i32
    %c0_i32_1 = arith.constant 0 : i32
    return %arg0, %c0_i32, %c0_i32_0 : i32, i32, i32
  }
  func.func @transform_1(%arg0: i32) -> (i32, i32, i32) {
    %c0_i32 = arith.constant 0 : i32
    %c0_i32_0 = arith.constant 0 : i32
    %c0_i32_1 = arith.constant 0 : i32
    return %arg0, %c0_i32, %c0_i32_0 : i32, i32, i32
  }
  func.func @transform_2(%arg0: i32) -> (i32, i32) {
    %c0_i32 = arith.constant 0 : i32
    %c0_i32_0 = arith.constant 0 : i32
    %c0_i32_1 = arith.constant 0 : i32
    return %c0_i32, %c0_i32_0 : i32, i32
  }
  func.func @transform_3(%arg0: i32) -> (i32, i32) {
    %c0_i32 = arith.constant 0 : i32
    %c0_i32_0 = arith.constant 0 : i32
    %c0_i32_1 = arith.constant 0 : i32
    return %c0_i32, %c0_i32_0 : i32, i32
  }
  func.func @transform_4(%arg0: i32) -> (i32, i32) {
    %c0_i32 = arith.constant 0 : i32
    %c0_i32_0 = arith.constant 0 : i32
    %c0_i32_1 = arith.constant 0 : i32
    return %c0_i32, %c0_i32_0 : i32, i32
  }
  func.func @transform_5(%arg0: i32) -> (i32, i32) {
    %c0_i32 = arith.constant 0 : i32
    %c0_i32_0 = arith.constant 0 : i32
    %c0_i32_1 = arith.constant 0 : i32
    return %c0_i32, %c0_i32_0 : i32, i32
  }
  func.func @transform_6(%arg0: i32) -> (i32, i32) {
    %c0_i32 = arith.constant 0 : i32
    %c0_i32_0 = arith.constant 0 : i32
    %c0_i32_1 = arith.constant 0 : i32
    return %c0_i32, %c0_i32_0 : i32, i32
  }
  func.func @transform_7(%arg0: i32) -> (i32, i32) {
    %c0_i32 = arith.constant 0 : i32
    %c0_i32_0 = arith.constant 0 : i32
    %c0_i32_1 = arith.constant 0 : i32
    return %c0_i32, %c0_i32_0 : i32, i32
  }
  func.func @transform_8(%arg0: i32) -> (i32, i32) {
    %c0_i32 = arith.constant 0 : i32
    %c0_i32_0 = arith.constant 0 : i32
    %c0_i32_1 = arith.constant 0 : i32
    return %c0_i32, %c0_i32_0 : i32, i32
  }
  func.func @transform_9(%arg0: i32) -> (i32, i32) {
    %c0_i32 = arith.constant 0 : i32
    %c0_i32_0 = arith.constant 0 : i32
    %c0_i32_1 = arith.constant 0 : i32
    return %c0_i32, %c0_i32_0 : i32, i32
  }
  func.func @transform_10(%arg0: i32) -> (i32, i32) {
    %c0_i32 = arith.constant 0 : i32
    %c0_i32_0 = arith.constant 0 : i32
    %c0_i32_1 = arith.constant 0 : i32
    return %c0_i32, %c0_i32_0 : i32, i32
  }
  func.func @transform_11(%arg0: i32) -> (i32, i32) {
    %c0_i32 = arith.constant 0 : i32
    %c0_i32_0 = arith.constant 0 : i32
    %c0_i32_1 = arith.constant 0 : i32
    return %c0_i32, %c0_i32_0 : i32, i32
  }
  func.func @transform_12(%arg0: i32) -> (i32, i32) {
    %c0_i32 = arith.constant 0 : i32
    %c0_i32_0 = arith.constant 0 : i32
    %c0_i32_1 = arith.constant 0 : i32
    return %c0_i32, %c0_i32_0 : i32, i32
  }
  func.func @transform_13(%arg0: i32) -> (i32, i32) {
    %c0_i32 = arith.constant 0 : i32
    %c0_i32_0 = arith.constant 0 : i32
    %c0_i32_1 = arith.constant 0 : i32
    return %c0_i32, %c0_i32_0 : i32, i32
  }
  func.func @transform_14(%arg0: i32) -> (i32, i32, i32) {
    %c0_i32 = arith.constant 0 : i32
    %c0_i32_0 = arith.constant 0 : i32
    %c0_i32_1 = arith.constant 0 : i32
    return %arg0, %c0_i32, %c0_i32_0 : i32, i32, i32
  }
}

</mosaic_0001>

<bundles_post_ra>
// kernel: gnn_forward.1
= control target key start
LH: loop header
LB: loop body
LE: loop exit
PB: predicated region body
PF: predicated region fallthrough
CT: control target
= control target key end

     0   :  { %s3394_s0 = inlined_call_operand.vmem [shape: bf16[8,32,17], index: 0, kind: input, shape index: {}]   ;;  %s3395_s1 = inlined_call_operand.vmem [shape: bf16[8,32,32], index: 1, kind: input, shape index: {}]   ;;  %s3396_s2 = inlined_call_operand.vmem [shape: bf16[17,256], index: 2, kind: input, shape index: {}]   ;;  %s3397_s3 = inlined_call_operand.vmem [shape: f32[1,256], index: 3, kind: input, shape index: {}]   ;;  %s3398_s4 = inlined_call_operand.hbm [shape: bf16[256,256], index: 4, kind: input, shape index: {}]   ;;  %s3399_s5 = inlined_call_operand.vmem [shape: f32[1,256], index: 5, kind: input, shape index: {}]   ;;  %s3400_s6 = inlined_call_operand.hbm [shape: bf16[256,256], index: 6, kind: input, shape index: {}]   ;;  %s3401_s7 = inlined_call_operand.vmem [shape: f32[1,256], index: 7, kind: input, shape index: {}]   ;;  %s3402_s8 = inlined_call_operand.hbm [shape: bf16[256,256], index: 8, kind: input, shape index: {}]   ;;  %s3403_s9 = inlined_call_operand.vmem [shape: f32[1,256], index: 9, kind: input, shape index: {}]   ;;  %s3404_s10 = inlined_call_operand.hbm [shape: bf16[256,256], index: 10, kind: input, shape index: {}]   ;;  %s3405_s11 = inlined_call_operand.vmem [shape: f32[1,256], index: 11, kind: input, shape index: {}]   ;;  %s3406_s12 = inlined_call_operand.hbm [shape: bf16[256,128], index: 12, kind: input, shape index: {}]   ;;  %s3407_s13 = inlined_call_operand.vmem [shape: f32[1,128], index: 13, kind: input, shape index: {}]   ;;  %s3408_s14 = inlined_call_operand.hbm [shape: f32[8,8,128], index: 14, kind: output, shape index: {}]  }
   0x1   :  { %3422 = sst [smem:[#allocation24_spill]] %s3400_s6 }
   0x2   :  { %3423 = sst [smem:[#allocation25_spill]] %s3407_s13 }
   0x3   :  { %3424 = sst [smem:[#allocation26_spill]] %s3408_s14 }
   0x4   :  { %19 = vsyncpa [#allocation3], 0 }
   0x5   :  { %20 = vsyncpa [#allocation6], 0 }
   0x6   :  { %21 = vsyncpa [#allocation9], 0 }
   0x7   :  { %22 = vsyncpa [#allocation4], 0 }
   0x8   :  { %24 = vsyncpa [#allocation4 + $0x1], 0  ;;  %s3081_s29 = smov 0   ;;  %s3083_s30 = smov 0  }
   0x9   :  { %s3085_s15 = smov 0   ;;  %s3087_s16 = smov 0  }
   0xa LB: > { %3425 = sst [smem:[#allocation16_spill]] %s2981_s29  ;;  %s3102_s17 = sadd.s32 4294967295, %s2993_s16   ;;  %s2993_s16 = sphi %s3087_s16, %s3456_s16   ;;  %s2989_s15 = sphi %s3085_s15, %s3459_s15   ;;  %s2985_s30 = sphi %s3083_s30, %s3458_s30   ;;  %s2981_s29 = sphi %s3081_s29, %s3457_s29  }
   0xb   : > { %3426 = sst [smem:[#allocation17_spill]] %s2985_s30  ;;  %s2243_s18 = sadd.s32 4294967294, %s2993_s16  }
   0xc   : > { %3427 = sst [smem:[#allocation18_spill]] %s2989_s15  ;;  %s3106_s19 = sadd.s32 1, %s2993_s16  }
   0xd   : > { %3428 = sst [smem:[#allocation19_spill]] %s2993_s16  ;;  %s341_s20 = sadd.s32 1, %s2989_s15 }
   0xe   : > { %3429 = sst [smem:[#allocation20_spill]] %s3106_s19  ;;  %s338_s21 = ssub.s32 %s2993_s16, %s3106_s19 }
   0xf   : > { %p351_p0 = scmp.ne.s32.totalorder %s2989_s15, %s2985_s30  ;;  %p339_p1 = scmp.eq.s32.totalorder %s338_s21, 0 }
  0x10   : > { %p352_p2 = scmp.eq.s32.totalorder %s3102_s17, 7  ;;  %p357_p3 = scmp.ne.s32.totalorder %s2985_s30, %s2981_s29 }
  0x11   : > { %p358_p4 = scmp.eq.s32.totalorder %s2243_s18, 7  ;;  %p2244_p7 = scmp.ge.s32.totalorder %s2993_s16, 1 }
  0x12   : > { %s3117_s22 = scalar_select %p339_p1, %s2989_s15, %s341_s20  }
  0x13   : > { %p3119_p5 = por %p352_p2, %p351_p0  ;;  %p3123_p6 = por %p358_p4, %p357_p3 }
  0x14   : > { %3430 = sst [smem:[#allocation21_spill]] %s3117_s22  ;;  %p365_p8 = scmp.lt.s32.totalorder %s2993_s16, 9 }
  0x15   : > { %s3431_s23 = scalar_select %p3119_p5, 1, 0 }
  0x16   : > { %s3433_s24 = scalar_select %p3123_p6, 1, 0 }
  0x17   : > { %3432 = sst [smem:[#allocation22_spill]] %s3431_s23  ;;  %p3415_p9 = scmp.eq.s32.totalorder %s3102_s17, 0 }
  0x18   : > { %3434 = sst [smem:[#allocation23_spill]] %s3433_s24  ;;  %p3130_p10 = pnand %p2244_p7, %p365_p8 }
  0x19   : > { %s2995_s26 = smov [#allocation5]   ;;  %s2996_s18 = smov [#allocation8]  }
  0x1a   : > { %s3435_s25 = scalar_select %p3130_p10, 1, 0 }
  0x1b   : > { %p2489_p11 = pneg %p3130_p10  ;;  %s399_s27 = sshll.u32 %s2995_s26, 4  ;;  %s3136_s27 = int_to_ptr.vmem [resolvable:$true] %s399_s27 }
  0x1c   : > { %s431_s20 = sshll.u32 %s2996_s18, 4  ;;  %s2997_s21 = smov [#allocation2]   ;;  %s3144_s20 = int_to_ptr.vmem [resolvable:$true] %s431_s20 }
  0x1d   : > { %p3140_p12 = pnand %p3415_p9, %p2489_p11  ;;  %s3146_s22 = sshll.u32 %s2997_s21, 4  ;;  %s384_s22 = int_to_ptr.vmem [resolvable:$true] %s3146_s22 }
  0x1e   : > { %s3437_s6 = sld [smem:[#allocation24_spill]] }
  0x1f   : > { %p3156_p0 = pneg %p3140_p12 }
  0x24   : > { %s2779_s24 = scalar_lea.hbm %s3437_s6, 4096 }
  0x25   : > { %p2780_p13 = scmp.ne.s32.totalorder %s3437_s6, %s2779_s24  ;;  %p2786_p3 = scmp.lt.u32.totalorder %s2779_s24, %s3437_s6 }
  0x27   : > { %p2782_p1 = pnand %p3156_p0, %p2780_p13 }
  0x29   : > { %p2783_p2 = pneg %p2782_p1 }
  0x2b   : > { %p2788_p4 = pnand %p2786_p3, %p2783_p2 }
  0x2d   : > { %2791 = shalt.err (!%p2788_p4)
}
  0x2e   : > { %s2792_s29 = scalar_lea.vmem %s3136_s27, 4096  ;;  %p2800_p9 = scmp.lt.s32.totalorder %s3136_s27, %s3136_s27 }
  0x2f   : > { %p2793_p7 = scmp.ne.s32.totalorder %s3136_s27, %s2792_s29  ;;  %p2801_p6 = scmp.lt.s32.totalorder %s2792_s29, %s2792_s29 }
  0x31   : > { %p2795_p8 = pnand %p2793_p7, %p3156_p0  ;;  %p2802_p13 = por %p2801_p6, %p2800_p9 }
  0x33   : > { %p2796_p11 = pneg %p2795_p8 }
  0x35   : > { %p2803_p1 = pnand %p2802_p13, %p2796_p11 }
  0x37   : > { %2806 = shalt.err (!%p2803_p1)
}
  0x38   : > { %s2998_s15 = smov 128   ;;  %s2999_s19 = smov 8  }
  0x39   : > { %2495 = dma.hbm_to_vmem [thread:$0]  (!%p3140_p12), %s3437_s6, 4096, %s3136_s27, [#allocation6], %s2998_s15, %s2998_s15, %s2999_s19  }
  0x3a   : > { %s2807_s29 = scalar_lea.hbm %s3404_s10, 4096 }
  0x3b   : > { %p2808_p6 = scmp.ne.s32.totalorder %s3404_s10, %s2807_s29  ;;  %p2814_p3 = scmp.lt.u32.totalorder %s2807_s29, %s3404_s10 }
  0x3d   : > { %p2810_p9 = pnand %p2808_p6, %p3156_p0 }
  0x3f   : > { %p2811_p2 = pneg %p2810_p9 }
  0x41   : > { %p2816_p4 = pnand %p2814_p3, %p2811_p2 }
  0x43   : > { %2819 = shalt.err (!%p2816_p4)
}
  0x44   : > { %s2820_s27 = scalar_lea.vmem %s3144_s20, 4096  ;;  %p2828_p13 = scmp.lt.s32.totalorder %s3144_s20, %s3144_s20 }
  0x45   : > { %p2821_p7 = scmp.ne.s32.totalorder %s3144_s20, %s2820_s27  ;;  %p2829_p1 = scmp.lt.s32.totalorder %s2820_s27, %s2820_s27 }
  0x47   : > { %p2823_p8 = pnand %p2821_p7, %p3156_p0  ;;  %p2830_p6 = por %p2829_p1, %p2828_p13 }
  0x49   : > { %p2824_p11 = pneg %p2823_p8 }
  0x4b   : > { %p2831_p9 = pnand %p2830_p6, %p2824_p11 }
  0x4d   : > { %2834 = shalt.err (!%p2831_p9)
}
  0x4e   : > { %2501 = dma.hbm_to_vmem [thread:$0]  (!%p3140_p12), %s3404_s10, 4096, %s3144_s20, [#allocation9], %s2998_s15, %s2998_s15, %s2999_s19  }
  0x4f   : > { %s2835_s24 = scalar_lea.hbm %s3398_s4, 4096 }
  0x50   : > { %p2836_p2 = scmp.ne.s32.totalorder %s3398_s4, %s2835_s24  ;;  %p2842_p7 = scmp.lt.u32.totalorder %s2835_s24, %s3398_s4 }
  0x52   : > { %p2838_p3 = pnand %p2836_p2, %p3156_p0 }
  0x54   : > { %p2839_p4 = pneg %p2838_p3 }
  0x56   : > { %p2844_p8 = pnand %p2842_p7, %p2839_p4 }
  0x58   : > { %2847 = shalt.err (!%p2844_p8)
}
  0x59   : > { %s2848_s27 = scalar_lea.vmem %s384_s22, 4096  ;;  %p2856_p6 = scmp.lt.s32.totalorder %s384_s22, %s384_s22 }
  0x5a   : > { %p2849_p11 = scmp.ne.s32.totalorder %s384_s22, %s2848_s27  ;;  %p2857_p9 = scmp.lt.s32.totalorder %s2848_s27, %s2848_s27 }
  0x5c   : > { %p2851_p13 = pnand %p2849_p11, %p3156_p0  ;;  %p2858_p5 = por %p2857_p9, %p2856_p6 }
  0x5e   : > { %p2852_p1 = pneg %p2851_p13 }
  0x60   : > { %p2859_p10 = pnand %p2858_p5, %p2852_p1 }
  0x62   : > { %2862 = shalt.err (!%p2859_p10)
}
  0x63   : > { %2492 = dma.hbm_to_vmem [thread:$0]  (!%p3140_p12), %s3398_s4, 4096, %s384_s22, [#allocation3], %s2998_s15, %s2998_s15, %s2999_s19  }
  0x64   : > { %s3000_s14 = smov [#allocation7]   ;;  %s3001_s23 = smov [#allocation10]  }
  0x65   : > { %s415_s30 = sshll.u32 %s3000_s14, 4  ;;  %s447_s24 = sshll.u32 %s3001_s23, 4  ;;  %s416_s30 = int_to_ptr.vmem [resolvable:$true] %s415_s30  ;;  %s448_s24 = int_to_ptr.vmem [resolvable:$true] %s447_s24 }
  0x66   : > { %s2863_s21 = scalar_lea.hbm %s3402_s8, 4096 }
  0x67   : > { %p2864_p5 = scmp.ne.s32.totalorder %s3402_s8, %s2863_s21  ;;  %p2870_p3 = scmp.lt.u32.totalorder %s2863_s21, %s3402_s8 }
  0x69   : > { %p2866_p10 = pnand %p2864_p5, %p3156_p0 }
  0x6b   : > { %p2867_p2 = pneg %p2866_p10 }
  0x6d   : > { %p2872_p4 = pnand %p2870_p3, %p2867_p2 }
  0x6f   : > { %2875 = shalt.err (!%p2872_p4)
}
  0x70   : > { %s2876_s22 = scalar_lea.vmem %s416_s30, 4096  ;;  %p2884_p13 = scmp.lt.s32.totalorder %s416_s30, %s416_s30 }
  0x71   : > { %p2877_p7 = scmp.ne.s32.totalorder %s416_s30, %s2876_s22  ;;  %p2885_p1 = scmp.lt.s32.totalorder %s2876_s22, %s2876_s22 }
  0x73   : > { %p2879_p8 = pnand %p2877_p7, %p3156_p0  ;;  %p2886_p6 = por %p2885_p1, %p2884_p13 }
  0x75   : > { %p2880_p11 = pneg %p2879_p8 }
  0x77   : > { %p2887_p9 = pnand %p2886_p6, %p2880_p11 }
  0x79   : > { %2890 = shalt.err (!%p2887_p9)
}
  0x7a   : > { %2498 = dma.hbm_to_vmem [thread:$0]  (!%p3140_p12), %s3402_s8, 4096, %s416_s30, [#allocation6], %s2998_s15, %s2998_s15, %s2999_s19  }
  0x7b   : > { %s2891_s26 = scalar_lea.hbm %s3406_s12, 2048 }
  0x7c   : > { %p2892_p5 = scmp.ne.s32.totalorder %s3406_s12, %s2891_s26  ;;  %p2898_p3 = scmp.lt.u32.totalorder %s2891_s26, %s3406_s12 }
  0x7e   : > { %p2894_p10 = pnand %p2892_p5, %p3156_p0 }
  0x80   : > { %p2895_p2 = pneg %p2894_p10 }
  0x82   : > { %p2900_p4 = pnand %p2898_p3, %p2895_p2 }
  0x84   : > { %2903 = shalt.err (!%p2900_p4)
}
  0x85   : > { %s2904_s20 = scalar_lea.vmem %s448_s24, 2048  ;;  %p2912_p13 = scmp.lt.s32.totalorder %s448_s24, %s448_s24 }
  0x86   : > { %p2905_p7 = scmp.ne.s32.totalorder %s448_s24, %s2904_s20  ;;  %p2913_p1 = scmp.lt.s32.totalorder %s2904_s20, %s2904_s20 }
  0x88   : > { %p2907_p8 = pnand %p2905_p7, %p3156_p0  ;;  %p2914_p6 = por %p2913_p1, %p2912_p13 }
  0x8a   : > { %p2908_p11 = pneg %p2907_p8 }
  0x8c   : > { %p2915_p9 = pnand %p2914_p6, %p2908_p11 }
  0x8e   : > { %2918 = shalt.err (!%p2915_p9)
}
  0x8f   : > { %s3002_s15 = smov 64   ;;  %s3003_s19 = smov 4  }
  0x90   : > { %2504 = dma.hbm_to_vmem [thread:$0]  (!%p3140_p12), %s3406_s12, 2048, %s448_s24, [#allocation9], %s3002_s15, %s3002_s15, %s3003_s19  }
  0x91   : > { %p3439_p5 = scmp.ne.s32.totalorder %s3435_s25, 0 }
  0x92   : > { %p3440_p10 = scmp.eq.s32.totalorder (!%p3439_p5), %s3102_s17, 0 }
  0x93   : > { %482 = sbr.rel (%p3439_p5) target bundleno = 1981 (0x7bd), region = 76 }
  0x9a   : > { %2964 = dma.done.wait (%p3440_p10), [#allocation3], 4096   ;;  %p3441_p0 = pmov %p3440_p10 }
  0x9c   : > { %2966 = vsyncadd (%p3441_p0), [#allocation3], 4294963200  ;;  %p3442_p2 = pmov %p3441_p0 }
  0x9d   : > { %p3443_p3 = pmov %p3441_p0 }
  0x9e   : > { %2968 = dma.done.wait (%p3442_p2), [#allocation6], 8192  }
  0x9f   : > { %2970 = vsyncadd (%p3443_p3), [#allocation6], 4294959104  ;;  %p3444_p4 = pmov %p3441_p0 }
  0xa0   : > { %p3445_p12 = pmov %p3441_p0 }
  0xa1   : > { %2972 = dma.done.wait (%p3444_p4), [#allocation9], 6144  }
  0xa2   : > { %2974 = vsyncadd (%p3445_p12), [#allocation9], 4294961152  ;;  %p549_p7 = scmp.lt.s32.totalorder %s3102_s17, 7  ;;  %vm590_vm0 = vcmask 261120   ;;  %v2566_v4 = vld [vmem:[%s3396_s2] ss:$8 sps:$4 sm:$0xff]   ;;  %v653_v51 = vlaneseq }
  0xa3   : > { %v2568_v5 = vld [vmem:[%s3396_s2 + $0x4] ss:$8 sps:$4 sm:$0xff]   ;;  %v650_v6 = vld [vmem:[%s3396_s2 + $0x10] sm:$0x11]  ;;  %vm685_vm1 = vcmask 1040384   ;;  %v3004_v9 = vmov 0  }
  0xa4   : > { %s550_s16 = scalar_select %p549_p7, %s3102_s17, 7  ;;  %v2271_v7 = vcombine.high %v650_v6, %v650_v6  ;;  %v2270_v8 = vcombine.low %v650_v6, %v650_v6  ;;  %v687_v10 = vsel %vm685_vm1, 65535, %v3004_v9  ;;  %v2571_v13 = vld [vmem:[#allocation2 + $0x4] ss:$8 sps:$4 sm:$0xff]   ;;  %v2573_v14 = vld [vmem:[#allocation2] ss:$8 sps:$4 sm:$0xff]  }
  0xa5   : > { %v2574_v15 = vld [vmem:[#allocation2 + $0x14] ss:$8 sps:$4 sm:$0xff]   ;;  %963 = vmatprep.subr.bf16.mxu0 %v2571_v13  ;;  %v2576_v16 = vld [vmem:[#allocation2 + $0x10] ss:$8 sps:$4 sm:$0xff]   ;;  %v2577_v17 = vld [vmem:[#allocation2 + $0x24] ss:$8 sps:$4 sm:$0xff]  }
  0xa6   : > { %s2431_s25 = sshll.u32 %s550_s16, 4  ;;  %v692_v11 = vand.u32 %v2271_v7, %v687_v10  ;;  %v689_v12 = vand.u32 %v2270_v8, %v687_v10  ;;  %964 = vmatpush1.bf16.msra.mxu0 %v2573_v14  ;;  %v2579_v18 = vld [vmem:[#allocation2 + $0x20] ss:$8 sps:$4 sm:$0xff]   ;;  %v2580_v19 = vld [vmem:[#allocation2 + $0x34] ss:$8 sps:$4 sm:$0xff]   ;;  %vm678_vm2 = vcmask 138240  }
  0xa7   : > { %s553_s6 = scalar_lea.vmem %s3394_s0, %s2431_s25  ;;  %s558_s23 = scalar_lea.vmem %s3395_s1, %s2431_s25  ;;  %965 = vmatprep.subr.bf16.mxu0 %v2574_v15  ;;  %v2582_v20 = vld [vmem:[#allocation2 + $0x30] ss:$8 sps:$4 sm:$0xff]   ;;  %v2583_v21 = vld [vmem:[#allocation2 + $0x44] ss:$8 sps:$4 sm:$0xff]   ;;  %v2585_v22 = vld [vmem:[#allocation2 + $0x40] ss:$8 sps:$4 sm:$0xff]  }
  0xa8   : > { %v2562_v0 = vld [vmem:[%s553_s6] sm:$0xff]   ;;  %v2563_v1 = vld [vmem:[%s553_s6 + $0x8] sm:$0xff]   ;;  %v2586_v23 = vld [vmem:[#allocation2 + $0x54] ss:$8 sps:$4 sm:$0xff]   ;;  %v654_v52 = vshrl.u32 %v653_v51, 7  ;;  %vm1667_vm3 = vcmask 1041409  }
  0xa9   : > { %2459 = vmatprep.subr.bf16.mxu1 %v2562_v0  ;;  %v3289_v2 = vld [vmem:[%s558_s23] sm:$0xff]   ;;  %v3293_v3 = vld [vmem:[%s558_s23 + $0x8] sm:$0xff]   ;;  %v2588_v24 = vld [vmem:[#allocation2 + $0x50] ss:$8 sps:$4 sm:$0xff]   ;;  %vm1669_vm4 = vcmask 1042434   ;;  %vm1671_vm5 = vcmask 1043459  }
  0xaa   : > { %2460 = vmatpush3.bf16.msra.mxu1 %v2562_v0  ;;  %2463 = vmatprep.mubr.msk.bf16.mxu1 %vm590_vm0, %v3289_v2  ;;  %v2589_v25 = vld [vmem:[#allocation2 + $0x64] ss:$8 sps:$4 sm:$0xff]   ;;  %v2591_v26 = vld [vmem:[#allocation2 + $0x60] ss:$8 sps:$4 sm:$0xff]   ;;  %v2592_v27 = vld [vmem:[#allocation2 + $0x74] ss:$8 sps:$4 sm:$0xff]  }
  0xab   : > { %2461 = vmatprep.subr.bf16.mxu1 %v2563_v1  ;;  %966 = vmatpush1.bf16.msra.mxu0 %v2576_v16  ;;  %v2594_v28 = vld [vmem:[#allocation2 + $0x70] ss:$8 sps:$4 sm:$0xff]   ;;  %v2595_v29 = vld [vmem:[#allocation2 + $0x84] ss:$8 sps:$4 sm:$0xff]   ;;  %v2597_v30 = vld [vmem:[#allocation2 + $0x80] ss:$8 sps:$4 sm:$0xff]  }
  0xac   : > { %967 = vmatprep.subr.bf16.mxu0 %v2577_v17  ;;  %v2598_v31 = vld [vmem:[#allocation2 + $0x94] ss:$8 sps:$4 sm:$0xff]   ;;  %v2600_v32 = vld [vmem:[#allocation2 + $0x90] ss:$8 sps:$4 sm:$0xff]   ;;  %v2601_v33 = vld [vmem:[#allocation2 + $0xa4] ss:$8 sps:$4 sm:$0xff]  }
  0xad   : > { %v2603_v34 = vld [vmem:[#allocation2 + $0xa0] ss:$8 sps:$4 sm:$0xff]   ;;  %v2604_v35 = vld [vmem:[#allocation2 + $0xb4] ss:$8 sps:$4 sm:$0xff]   ;;  %v2606_v36 = vld [vmem:[#allocation2 + $0xb0] ss:$8 sps:$4 sm:$0xff]  }
  0xae   : > { %2462 = vmatpush3.bf16.msra.mxu1 %v2563_v1  ;;  %v2607_v37 = vld [vmem:[#allocation2 + $0xc4] ss:$8 sps:$4 sm:$0xff]   ;;  %v2609_v38 = vld [vmem:[#allocation2 + $0xc0] ss:$8 sps:$4 sm:$0xff]   ;;  %v2610_v39 = vld [vmem:[#allocation2 + $0xd4] ss:$8 sps:$4 sm:$0xff]  }
  0xaf   : > { %694 = vmatprep.subr.bf16.mxu1 %v2568_v5  ;;  %968 = vmatpush1.bf16.msra.mxu0 %v2579_v18  ;;  %v2612_v46 = vld [vmem:[#allocation2 + $0xd0] ss:$8 sps:$4 sm:$0xff]   ;;  %v2613_v47 = vld [vmem:[#allocation2 + $0xe4] ss:$8 sps:$4 sm:$0xff]   ;;  %v2615_v48 = vld [vmem:[#allocation2 + $0xe0] ss:$8 sps:$4 sm:$0xff]  }
  0xb0   : > { %969 = vmatprep.subr.bf16.mxu0 %v2580_v19  ;;  %v2616_v49 = vld [vmem:[#allocation2 + $0xf4] ss:$8 sps:$4 sm:$0xff]   ;;  %v2618_v50 = vld [vmem:[#allocation2 + $0xf0] ss:$8 sps:$4 sm:$0xff]   ;;  %v3310_v53 = vsub.s32 0, %v654_v52  ;;  %v3315_v55 = vsub.s32 1, %v654_v52 }
  0xb1   : > { %2464 = vmatmul.mubr.msk.bf16.vlgmr.msra.gmra.mrb[0].mxu1 %vm590_vm0, %v3293_v3  ;;  %v651_v54 = vld [vmem:[%s3397_s3] sm:$0x3]  ;;  %vm1678_vm6 = vcmask 1043456   ;;  %s3446_s14 = sld [smem:[#allocation17_spill]]  ;;  %s3447_s29 = sld [smem:[#allocation25_spill]] }
  0xb2   : > { %695 = vmatpush1.bf16.msra.mxu1 %v2566_v4  ;;  %726 = vmatprep.mubr.bf16.mxu1 %v3004_v9  ;;  %v656_v56 = vrot.slane %v651_v54, %v3310_v53  ;;  %v660_v57 = vrot.slane %v651_v54, %v3315_v55  ;;  %vm2404_vm7 = vmpackc.low %vm1678_vm6, %vm1678_vm6  ;;  %s3448_s27 = sld [smem:[#allocation22_spill]]  ;;  %s2428_s20 = sshll.u32 %s3102_s17, 7 }
  0xb3   : > { %696 = vmatprep.subr.bf16.mxu1 %v692_v11  ;;  %970 = vmatpush1.bf16.msra.mxu0 %v2582_v20  ;;  %s3449_s16 = sld [smem:[#allocation26_spill]]  ;;  %s3005_s17 = smov [#allocation11]  }
  0xb4   : > { %971 = vmatprep.subr.bf16.mxu0 %v2583_v21  ;;  %s2923_s13 = sshll.u32 %s3005_s17, 4  ;;  %s2924_s13 = int_to_ptr.vmem [resolvable:$false] %s2923_s13 }
  0xb6   : > { %697 = vmatpush1.bf16.msra.mxu1 %v689_v12 }
  0xb7   : > { %972 = vmatpush1.bf16.msra.mxu0 %v2585_v22  ;;  %s546_s23 = sand.u32 1, %s3446_s14   ;;  %s2925_s14 = scalar_lea.vmem %s2924_s13, 256 }
  0xb8   : > { %973 = vmatprep.subr.bf16.mxu0 %v2586_v23  ;;  %s2257_s26 = sshll.u32 %s546_s23, 3  ;;  %s2109_s24 = scalar_lea.sflag [#allocation4], %s546_s23 }
  0xb9   : > { %s548_s15 = scalar_lea.vmem [#allocation11], %s2257_s26  ;;  %s3450_s25 = smov %s3449_s16 }
  0xba   : > { %s2122_s19 = sshll.u32 %s548_s15, 4  ;;  %s3352_s28 = scalar_lea.hbm %s3449_s16, %s2428_s20  ;;  %s3354_s19 = int_to_ptr.vmem [resolvable:$true] %s2122_s19 }
  0xbb   : > { %974 = vmatpush1.bf16.msra.mxu0 %v2588_v24  ;;  %s2919_s6 = scalar_lea.vmem %s3354_s19, 128  ;;  %p3451_p11 = scmp.ne.s32.totalorder %s3448_s27, 0 }
  0xbc   : > { %975 = vmatprep.subr.bf16.mxu0 %v2589_v25  ;;  %v791_v25 = vld [vmem:[%s3399_s5] sm:$0x3]  ;;  %p2920_p8 = scmp.ne.s32.totalorder %s3354_s19, %s2919_s6  ;;  %p2926_p6 = scmp.lt.s32.totalorder %s3354_s19, %s2924_s13 }
  0xbd   : > { %p2927_p9 = scmp.lt.s32.totalorder %s2925_s14, %s2919_s6 }
  0xbe   : > { %p2921_p13 = pnand %p2920_p8, %p3451_p11 }
  0xbf   : > { %976 = vmatpush1.bf16.msra.mxu0 %v2591_v26  ;;  %v796_v26 = vrot.slane %v791_v25, %v3310_v53  ;;  %p2928_p5 = por %p2927_p9, %p2926_p6 }
  0xc0   : > { %977 = vmatprep.subr.bf16.mxu0 %v2592_v27  ;;  %v800_v27 = vrot.slane %v791_v25, %v3315_v55  ;;  %v2664_v25 = vld [vmem:[#allocation5 + $0xf0] ss:$8 sps:$4 sm:$0xff]   ;;  %p2922_p1 = pneg %p2921_p13 }
  0xc2   : > { %p2929_p10 = pnand %p2928_p5, %p2922_p1 }
  0xc3   : > { %978 = vmatpush1.bf16.msra.mxu0 %v2594_v28 }
  0xc4   : > { %979 = vmatprep.subr.bf16.mxu0 %v2595_v29 }
  0xc7   : > { %980 = vmatpush1.bf16.msra.mxu0 %v2597_v30 }
  0xc8   : > { %981 = vmatprep.subr.bf16.mxu0 %v2598_v31 }
  0xcb   : > { %982 = vmatpush1.bf16.msra.mxu0 %v2600_v32 }
  0xcc   : > { %983 = vmatprep.subr.bf16.mxu0 %v2601_v33 }
  0xcf   : > { %984 = vmatpush1.bf16.msra.mxu0 %v2603_v34 }
  0xd0   : > { %985 = vmatprep.subr.bf16.mxu0 %v2604_v35 }
  0xd3   : > { %986 = vmatpush1.bf16.msra.mxu0 %v2606_v36 }
  0xd4   : > { %987 = vmatprep.subr.bf16.mxu0 %v2607_v37 }
  0xd7   : > { %988 = vmatpush1.bf16.msra.mxu0 %v2609_v38 }
  0xd8   : > { %989 = vmatprep.subr.bf16.mxu0 %v2610_v39 }
  0xdb   : > { %990 = vmatpush1.bf16.msra.mxu0 %v2612_v46 }
  0xdc   : > { %991 = vmatprep.subr.bf16.mxu0 %v2613_v47 }
  0xdf   : > { %992 = vmatpush1.bf16.msra.mxu0 %v2615_v48 }
  0xe0   : > { %993 = vmatprep.subr.bf16.mxu0 %v2616_v49 }
  0xe3   : > { %994 = vmatpush1.bf16.msra.mxu0 %v2618_v50 }
 0x184   : > { %v2465_v40 = vpop.f32.mrb[0].mxu1 }
 0x185   : > { %v631_v41 = vpop.f32.mrb[1].mxu1 }
 0x186   : > { %v2466_v42 = vpop.f32.mrb[2].mxu1 }
 0x187   : > { %v647_v43 = vpack.c.bf16 %v2466_v42, %v2465_v40  ;;  %v634_v44 = vpop.f32.mrb[3].mxu1 }
 0x188   : > { %v646_v45 = vpack.c.bf16 %v634_v44, %v631_v41 }
 0x18a   : > { %2272 = vmatmul.mubr.msk.bf16.vlgmr.msra.gmra.mrb[4].mxu1 %vm678_vm2, %v646_v45 }
 0x18b   : > { %736 = vmatprep.mubr.bf16.mxu1 %v3004_v9 }
 0x192   : > { %2273 = vmatmul.mubr.msk.bf16.gmra.mrb[8].mxu1 %vm678_vm2, %v647_v43 }
 0x193   : > { %1060 = vmatprep.mubr.bf16.mxu1 %v3004_v9 }
 0x25d   : > { %v728_v58 = vpop.f32.mrb[4].mxu1 }
 0x25e   : > { %v729_v59 = vadd.f32 %v728_v58, %v656_v56  ;;  %v730_v60 = vpop.f32.mrb[5].mxu1  ;;  %v2621_v58 = vld [vmem:[#allocation5 + $0x4] ss:$8 sps:$4 sm:$0xff]  }
 0x25f   : > { %v731_v61 = vadd.f32 %v730_v60, %v660_v57  ;;  %v732_v62 = vpop.f32.mrb[6].mxu1  ;;  %v2624_v60 = vld [vmem:[#allocation5 + $0x14] ss:$8 sps:$4 sm:$0xff]  }
 0x260   : > { %v733_v63 = vadd.f32 %v732_v62, %v656_v56  ;;  %v734_v0 = vpop.f32.mrb[7].mxu1  ;;  %v747_v4 = vmax.f32 %v729_v59, 0.0  ;;  %v2619_v59 = vld [vmem:[#allocation5] ss:$8 sps:$4 sm:$0xff]   ;;  %v2627_v62 = vld [vmem:[#allocation5 + $0x24] ss:$8 sps:$4 sm:$0xff]  }
 0x261   : > { %v735_v1 = vadd.f32 %v734_v0, %v660_v57  ;;  %v748_v6 = vmax.f32 %v731_v61, 0.0  ;;  %v2622_v61 = vld [vmem:[#allocation5 + $0x10] ss:$8 sps:$4 sm:$0xff]   ;;  %v2630_v0 = vld [vmem:[#allocation5 + $0x34] ss:$8 sps:$4 sm:$0xff]  }
 0x262   : > { %v749_v5 = vmax.f32 %v733_v63, 0.0  ;;  %v2625_v63 = vld [vmem:[#allocation5 + $0x20] ss:$8 sps:$4 sm:$0xff]  }
 0x263   : > { %v750_v7 = vmax.f32 %v735_v1, 0.0  ;;  %v2628_v1 = vld [vmem:[#allocation5 + $0x30] ss:$8 sps:$4 sm:$0xff]  }
 0x264   : > { %v755_v8 = vpack.c.bf16 %v749_v5, %v747_v4  ;;  %v2633_v4 = vld [vmem:[#allocation5 + $0x44] ss:$8 sps:$4 sm:$0xff]   ;;  %v2631_v5 = vld [vmem:[#allocation5 + $0x40] ss:$8 sps:$4 sm:$0xff]  }
 0x265   : > { %v738_v10 = vpop.f32.mrb[8].mxu1  ;;  %v756_v11 = vpack.c.bf16 %v750_v7, %v748_v6  ;;  %v2639_v6 = vld [vmem:[#allocation5 + $0x64] ss:$8 sps:$4 sm:$0xff]   ;;  %v2637_v7 = vld [vmem:[#allocation5 + $0x60] ss:$8 sps:$4 sm:$0xff]  }
 0x266   : > { %v739_v12 = vadd.f32 %v738_v10, %v656_v56  ;;  %v740_v13 = vpop.f32.mrb[9].mxu1  ;;  %v2640_v10 = vld [vmem:[#allocation5 + $0x70] ss:$8 sps:$4 sm:$0xff]  }
 0x267   : > { %v741_v14 = vadd.f32 %v740_v13, %v660_v57  ;;  %v742_v15 = vpop.f32.mrb[10].mxu1  ;;  %995 = vmatprep.mubr.bf16.mxu0 %v756_v11  ;;  %v2643_v11 = vld [vmem:[#allocation5 + $0x80] ss:$8 sps:$4 sm:$0xff]   ;;  %v2646_v13 = vld [vmem:[#allocation5 + $0x90] ss:$8 sps:$4 sm:$0xff]  }
 0x268   : > { %v743_v16 = vadd.f32 %v742_v15, %v656_v56  ;;  %v744_v17 = vpop.f32.mrb[11].mxu1  ;;  %996 = vmatmul.mubr.bf16.vlgmr.msra.gmra.mrb[0].mxu0 %v755_v8  ;;  %v751_v19 = vmax.f32 %v739_v12, 0.0  ;;  %v2642_v8 = vld [vmem:[#allocation5 + $0x74] ss:$8 sps:$4 sm:$0xff]   ;;  %v2649_v15 = vld [vmem:[#allocation5 + $0xa0] ss:$8 sps:$4 sm:$0xff]  }
 0x269   : > { %v745_v18 = vadd.f32 %v744_v17, %v660_v57  ;;  %v752_v21 = vmax.f32 %v741_v14, 0.0  ;;  %v2648_v12 = vld [vmem:[#allocation5 + $0x94] ss:$8 sps:$4 sm:$0xff]   ;;  %v2651_v14 = vld [vmem:[#allocation5 + $0xa4] ss:$8 sps:$4 sm:$0xff]  }
 0x26a   : > { %v753_v20 = vmax.f32 %v743_v16, 0.0  ;;  %v2654_v16 = vld [vmem:[#allocation5 + $0xb4] ss:$8 sps:$4 sm:$0xff]   ;;  %v2652_v17 = vld [vmem:[#allocation5 + $0xb0] ss:$8 sps:$4 sm:$0xff]  }
 0x26b   : > { %v754_v22 = vmax.f32 %v745_v18, 0.0  ;;  %v2657_v18 = vld [vmem:[#allocation5 + $0xc4] ss:$8 sps:$4 sm:$0xff]  }
 0x26c   : > { %v757_v23 = vpack.c.bf16 %v753_v20, %v751_v19  ;;  %v2655_v19 = vld [vmem:[#allocation5 + $0xc0] ss:$8 sps:$4 sm:$0xff]   ;;  %v2660_v20 = vld [vmem:[#allocation5 + $0xd4] ss:$8 sps:$4 sm:$0xff]  }
 0x26d   : > { %v758_v24 = vpack.c.bf16 %v754_v22, %v752_v21  ;;  %v2658_v21 = vld [vmem:[#allocation5 + $0xd0] ss:$8 sps:$4 sm:$0xff]   ;;  %v2663_v22 = vld [vmem:[#allocation5 + $0xe4] ss:$8 sps:$4 sm:$0xff]  }
 0x26f   : > { %1005 = vmatprep.mubr.bf16.mxu0 %v758_v24  ;;  %v2666_v24 = vld [vmem:[#allocation5 + $0xf4] ss:$8 sps:$4 sm:$0xff]  }
 0x270   : > { %1006 = vmatmul.mubr.bf16.gmra.mrb[4].mxu0 %v757_v23  ;;  %v2661_v23 = vld [vmem:[#allocation5 + $0xe0] ss:$8 sps:$4 sm:$0xff]  }
 0x33b   : > { %v997_v28 = vpop.f32.mrb[0].mxu0 }
 0x33c   : > { %v998_v29 = vadd.f32 %v997_v28, %v796_v26  ;;  %v999_v30 = vpop.f32.mrb[1].mxu0  ;;  %v2672_v28 = vld [vmem:[#allocation7 + $0x14] ss:$8 sps:$4 sm:$0xff]  }
 0x33d   : > { %v1000_v31 = vadd.f32 %v999_v30, %v800_v27  ;;  %v1001_v32 = vpop.f32.mrb[2].mxu0  ;;  %v2675_v30 = vld [vmem:[#allocation7 + $0x24] ss:$8 sps:$4 sm:$0xff]  }
 0x33e   : > { %v1002_v33 = vadd.f32 %v1001_v32, %v796_v26  ;;  %v1003_v34 = vpop.f32.mrb[3].mxu0  ;;  %v1016_v36 = vmax.f32 %v998_v29, 0.0  ;;  %v2670_v29 = vld [vmem:[#allocation7 + $0x10] ss:$8 sps:$4 sm:$0xff]   ;;  %v2678_v32 = vld [vmem:[#allocation7 + $0x34] ss:$8 sps:$4 sm:$0xff]  }
 0x33f   : > { %v1004_v35 = vadd.f32 %v1003_v34, %v800_v27  ;;  %v1017_v38 = vmax.f32 %v1000_v31, 0.0  ;;  %v2673_v31 = vld [vmem:[#allocation7 + $0x20] ss:$8 sps:$4 sm:$0xff]   ;;  %v2681_v34 = vld [vmem:[#allocation7 + $0x44] ss:$8 sps:$4 sm:$0xff]  }
 0x340   : > { %v1018_v37 = vmax.f32 %v1002_v33, 0.0  ;;  %v2676_v33 = vld [vmem:[#allocation7 + $0x30] ss:$8 sps:$4 sm:$0xff]  }
 0x341   : > { %v1019_v39 = vmax.f32 %v1004_v35, 0.0  ;;  %v2679_v35 = vld [vmem:[#allocation7 + $0x40] ss:$8 sps:$4 sm:$0xff]  }
 0x342   : > { %v1024_v40 = vpack.c.bf16 %v1018_v37, %v1016_v36  ;;  %v2684_v36 = vld [vmem:[#allocation7 + $0x54] ss:$8 sps:$4 sm:$0xff]   ;;  %v2682_v37 = vld [vmem:[#allocation7 + $0x50] ss:$8 sps:$4 sm:$0xff]  }
 0x343   : > { %v1025_v41 = vpack.c.bf16 %v1019_v39, %v1017_v38  ;;  %v1007_v42 = vpop.f32.mrb[4].mxu0  ;;  %v2687_v38 = vld [vmem:[#allocation7 + $0x64] ss:$8 sps:$4 sm:$0xff]   ;;  %v2685_v39 = vld [vmem:[#allocation7 + $0x60] ss:$8 sps:$4 sm:$0xff]  }
 0x344   : > { %v1008_v43 = vadd.f32 %v1007_v42, %v796_v26  ;;  %v1009_v44 = vpop.f32.mrb[5].mxu0  ;;  %v2693_v42 = vld [vmem:[#allocation7 + $0x84] ss:$8 sps:$4 sm:$0xff]  }
 0x345   : > { %v1010_v45 = vadd.f32 %v1009_v44, %v800_v27  ;;  %v1011_v46 = vpop.f32.mrb[6].mxu0  ;;  %1028 = vmatprep.subr.bf16.mxu1 %v1025_v41  ;;  %v2688_v41 = vld [vmem:[#allocation7 + $0x70] ss:$8 sps:$4 sm:$0xff]   ;;  %v2696_v44 = vld [vmem:[#allocation7 + $0x94] ss:$8 sps:$4 sm:$0xff]  }
 0x346   : > { %v1012_v47 = vadd.f32 %v1011_v46, %v796_v26  ;;  %v1013_v48 = vpop.f32.mrb[7].mxu0  ;;  %1029 = vmatpush1.bf16.msra.mxu1 %v1024_v40  ;;  %v1020_v50 = vmax.f32 %v1008_v43, 0.0  ;;  %v2667_v26 = vld [vmem:[#allocation7] ss:$8 sps:$4 sm:$0xff]   ;;  %v2690_v40 = vld [vmem:[#allocation7 + $0x74] ss:$8 sps:$4 sm:$0xff]  }
 0x347   : > { %v1014_v49 = vadd.f32 %v1013_v48, %v800_v27  ;;  %v1021_v52 = vmax.f32 %v1010_v45, 0.0  ;;  %v2669_v27 = vld [vmem:[#allocation7 + $0x4] ss:$8 sps:$4 sm:$0xff]   ;;  %v2691_v43 = vld [vmem:[#allocation7 + $0x80] ss:$8 sps:$4 sm:$0xff]  }
 0x348   : > { %v1022_v51 = vmax.f32 %v1012_v47, 0.0  ;;  %1558 = vmatprep.subr.bf16.mxu0 %v2669_v27  ;;  %v2694_v45 = vld [vmem:[#allocation7 + $0x90] ss:$8 sps:$4 sm:$0xff]   ;;  %v2699_v46 = vld [vmem:[#allocation7 + $0xa4] ss:$8 sps:$4 sm:$0xff]  }
 0x349   : > { %v1023_v54 = vmax.f32 %v1014_v49, 0.0  ;;  %1559 = vmatpush1.bf16.msra.mxu0 %v2667_v26  ;;  %v2697_v47 = vld [vmem:[#allocation7 + $0xa0] ss:$8 sps:$4 sm:$0xff]   ;;  %v2702_v48 = vld [vmem:[#allocation7 + $0xb4] ss:$8 sps:$4 sm:$0xff]  }
 0x34a   : > { %v1026_v56 = vpack.c.bf16 %v1022_v51, %v1020_v50  ;;  %1560 = vmatprep.subr.bf16.mxu0 %v2672_v28  ;;  %v2700_v49 = vld [vmem:[#allocation7 + $0xb0] ss:$8 sps:$4 sm:$0xff]   ;;  %v2705_v50 = vld [vmem:[#allocation7 + $0xc4] ss:$8 sps:$4 sm:$0xff]   ;;  %v2703_v51 = vld [vmem:[#allocation7 + $0xc0] ss:$8 sps:$4 sm:$0xff]  }
 0x34b   : > { %v1027_v57 = vpack.c.bf16 %v1023_v54, %v1021_v52  ;;  %v2708_v52 = vld [vmem:[#allocation7 + $0xd4] ss:$8 sps:$4 sm:$0xff]   ;;  %v2706_v54 = vld [vmem:[#allocation7 + $0xd0] ss:$8 sps:$4 sm:$0xff]   ;;  %v1117_v26 = vld [vmem:[%s3401_s7] sm:$0x3] }
 0x34c   : > { %v1122_v27 = vrot.slane %v1117_v26, %v3310_v53  ;;  %v1126_v28 = vrot.slane %v1117_v26, %v3315_v55 }
 0x34d   : > { %1030 = vmatprep.subr.bf16.mxu1 %v1027_v57  ;;  %1561 = vmatpush1.bf16.msra.mxu0 %v2670_v29 }
 0x34e   : > { %1031 = vmatpush1.bf16.msra.mxu1 %v1026_v56  ;;  %1562 = vmatprep.subr.bf16.mxu0 %v2675_v30 }
 0x34f   : > { %1289 = vmatprep.subr.bf16.mxu1 %v2621_v58 }
 0x351   : > { %2306 = vmatmul.mubr.msk.bf16.vlgmr.msra.gmra.mrb[12].mxu1 %vm590_vm0, %v3289_v2  ;;  %v2636_v2 = vld [vmem:[#allocation5 + $0x54] ss:$8 sps:$4 sm:$0xff]   ;;  %1563 = vmatpush1.bf16.msra.mxu0 %v2673_v31 }
 0x352   : > { %1070 = vmatprep.mubr.bf16.mxu1 %v3004_v9  ;;  %1290 = vmatpush1.bf16.msra.mxu1 %v2619_v59  ;;  %v2634_v9 = vld [vmem:[#allocation5 + $0x50] ss:$8 sps:$4 sm:$0xff]  }
 0x353   : > { %1291 = vmatprep.subr.bf16.mxu1 %v2624_v60  ;;  %1564 = vmatprep.subr.bf16.mxu0 %v2678_v32 }
 0x355   : > { %1565 = vmatpush1.bf16.msra.mxu0 %v2676_v33 }
 0x356   : > { %1292 = vmatpush1.bf16.msra.mxu1 %v2622_v61  ;;  %1566 = vmatprep.subr.bf16.mxu0 %v2681_v34 }
 0x357   : > { %1293 = vmatprep.subr.bf16.mxu1 %v2627_v62 }
 0x359   : > { %2307 = vmatmul.mubr.msk.bf16.gmra.mrb[16].mxu1 %vm590_vm0, %v3293_v3  ;;  %v2645_v3 = vld [vmem:[#allocation5 + $0x84] ss:$8 sps:$4 sm:$0xff]   ;;  %1567 = vmatpush1.bf16.msra.mxu0 %v2679_v35 }
 0x35a   : > { %1294 = vmatpush1.bf16.msra.mxu1 %v2625_v63  ;;  %1568 = vmatprep.subr.bf16.mxu0 %v2684_v36 }
 0x35b   : > { %1295 = vmatprep.subr.bf16.mxu1 %v2630_v0 }
 0x35d   : > { %1569 = vmatpush1.bf16.msra.mxu0 %v2682_v37 }
 0x35e   : > { %1296 = vmatpush1.bf16.msra.mxu1 %v2628_v1  ;;  %1570 = vmatprep.subr.bf16.mxu0 %v2687_v38 }
 0x35f   : > { %1297 = vmatprep.subr.bf16.mxu1 %v2633_v4 }
 0x361   : > { %1571 = vmatpush1.bf16.msra.mxu0 %v2685_v39 }
 0x362   : > { %1298 = vmatpush1.bf16.msra.mxu1 %v2631_v5  ;;  %1572 = vmatprep.subr.bf16.mxu0 %v2690_v40 }
 0x363   : > { %1299 = vmatprep.subr.bf16.mxu1 %v2636_v2  ;;  %v2711_v2 = vld [vmem:[#allocation7 + $0xe4] ss:$8 sps:$4 sm:$0xff]  }
 0x365   : > { %1573 = vmatpush1.bf16.msra.mxu0 %v2688_v41 }
 0x366   : > { %1300 = vmatpush1.bf16.msra.mxu1 %v2634_v9  ;;  %1574 = vmatprep.subr.bf16.mxu0 %v2693_v42  ;;  %v2709_v9 = vld [vmem:[#allocation7 + $0xe0] ss:$8 sps:$4 sm:$0xff]  }
 0x367   : > { %1301 = vmatprep.subr.bf16.mxu1 %v2639_v6  ;;  %v2714_v6 = vld [vmem:[#allocation7 + $0xf4] ss:$8 sps:$4 sm:$0xff]  }
 0x369   : > { %1575 = vmatpush1.bf16.msra.mxu0 %v2691_v43 }
 0x36a   : > { %1302 = vmatpush1.bf16.msra.mxu1 %v2637_v7  ;;  %1576 = vmatprep.subr.bf16.mxu0 %v2696_v44  ;;  %v2712_v7 = vld [vmem:[#allocation7 + $0xf0] ss:$8 sps:$4 sm:$0xff]  }
 0x36b   : > { %1303 = vmatprep.subr.bf16.mxu1 %v2642_v8  ;;  %v2715_v8 = vld [vmem:[#allocation8] ss:$8 sps:$4 sm:$0xff]  }
 0x36d   : > { %1577 = vmatpush1.bf16.msra.mxu0 %v2694_v45 }
 0x36e   : > { %1304 = vmatpush1.bf16.msra.mxu1 %v2640_v10  ;;  %1578 = vmatprep.subr.bf16.mxu0 %v2699_v46  ;;  %v2717_v10 = vld [vmem:[#allocation8 + $0x4] ss:$8 sps:$4 sm:$0xff]  }
 0x36f   : > { %1305 = vmatprep.subr.bf16.mxu1 %v2645_v3  ;;  %v2720_v3 = vld [vmem:[#allocation8 + $0x14] ss:$8 sps:$4 sm:$0xff]  }
 0x371   : > { %1579 = vmatpush1.bf16.msra.mxu0 %v2697_v47 }
 0x372   : > { %1306 = vmatpush1.bf16.msra.mxu1 %v2643_v11  ;;  %1580 = vmatprep.subr.bf16.mxu0 %v2702_v48  ;;  %v2718_v11 = vld [vmem:[#allocation8 + $0x10] ss:$8 sps:$4 sm:$0xff]  }
 0x373   : > { %1307 = vmatprep.subr.bf16.mxu1 %v2648_v12  ;;  %v2723_v12 = vld [vmem:[#allocation8 + $0x24] ss:$8 sps:$4 sm:$0xff]  }
 0x375   : > { %1581 = vmatpush1.bf16.msra.mxu0 %v2700_v49 }
 0x376   : > { %1308 = vmatpush1.bf16.msra.mxu1 %v2646_v13  ;;  %1582 = vmatprep.subr.bf16.mxu0 %v2705_v50  ;;  %v2721_v13 = vld [vmem:[#allocation8 + $0x20] ss:$8 sps:$4 sm:$0xff]  }
 0x377   : > { %1309 = vmatprep.subr.bf16.mxu1 %v2651_v14  ;;  %v2726_v14 = vld [vmem:[#allocation8 + $0x34] ss:$8 sps:$4 sm:$0xff]  }
 0x379   : > { %1583 = vmatpush1.bf16.msra.mxu0 %v2703_v51 }
 0x37a   : > { %1310 = vmatpush1.bf16.msra.mxu1 %v2649_v15  ;;  %1584 = vmatprep.subr.bf16.mxu0 %v2708_v52  ;;  %v2724_v15 = vld [vmem:[#allocation8 + $0x30] ss:$8 sps:$4 sm:$0xff]  }
 0x37b   : > { %1311 = vmatprep.subr.bf16.mxu1 %v2654_v16  ;;  %v2729_v16 = vld [vmem:[#allocation8 + $0x44] ss:$8 sps:$4 sm:$0xff]  }
 0x37d   : > { %1585 = vmatpush1.bf16.msra.mxu0 %v2706_v54 }
 0x37e   : > { %1312 = vmatpush1.bf16.msra.mxu1 %v2652_v17  ;;  %1586 = vmatprep.subr.bf16.mxu0 %v2711_v2  ;;  %v2727_v17 = vld [vmem:[#allocation8 + $0x40] ss:$8 sps:$4 sm:$0xff]   ;;  %v2754_v2 = vld [vmem:[#allocation8 + $0xd0] ss:$8 sps:$4 sm:$0xff]  }
 0x37f   : > { %1313 = vmatprep.subr.bf16.mxu1 %v2657_v18  ;;  %v2732_v18 = vld [vmem:[#allocation8 + $0x54] ss:$8 sps:$4 sm:$0xff]  }
 0x381   : > { %1587 = vmatpush1.bf16.msra.mxu0 %v2709_v9  ;;  %v2759_v9 = vld [vmem:[#allocation8 + $0xe4] ss:$8 sps:$4 sm:$0xff]  }
 0x382   : > { %1314 = vmatpush1.bf16.msra.mxu1 %v2655_v19  ;;  %1588 = vmatprep.subr.bf16.mxu0 %v2714_v6  ;;  %v2730_v19 = vld [vmem:[#allocation8 + $0x50] ss:$8 sps:$4 sm:$0xff]   ;;  %v2757_v6 = vld [vmem:[#allocation8 + $0xe0] ss:$8 sps:$4 sm:$0xff]  }
 0x383   : > { %1315 = vmatprep.subr.bf16.mxu1 %v2660_v20  ;;  %v2735_v20 = vld [vmem:[#allocation8 + $0x64] ss:$8 sps:$4 sm:$0xff]  }
 0x385   : > { %1589 = vmatpush1.bf16.msra.mxu0 %v2712_v7  ;;  %v2760_v7 = vld [vmem:[#allocation8 + $0xf0] ss:$8 sps:$4 sm:$0xff]  }
 0x386   : > { %1316 = vmatpush1.bf16.msra.mxu1 %v2658_v21  ;;  %v2733_v21 = vld [vmem:[#allocation8 + $0x60] ss:$8 sps:$4 sm:$0xff]  }
 0x387   : > { %1317 = vmatprep.subr.bf16.mxu1 %v2663_v22  ;;  %v2738_v22 = vld [vmem:[#allocation8 + $0x74] ss:$8 sps:$4 sm:$0xff]  }
 0x38a   : > { %1318 = vmatpush1.bf16.msra.mxu1 %v2661_v23  ;;  %v2736_v23 = vld [vmem:[#allocation8 + $0x70] ss:$8 sps:$4 sm:$0xff]  }
 0x38b   : > { %1319 = vmatprep.subr.bf16.mxu1 %v2666_v24  ;;  %v2741_v24 = vld [vmem:[#allocation8 + $0x84] ss:$8 sps:$4 sm:$0xff]  }
 0x38e   : > { %1320 = vmatpush1.bf16.msra.mxu1 %v2664_v25  ;;  %v2739_v25 = vld [vmem:[#allocation8 + $0x80] ss:$8 sps:$4 sm:$0xff]  }
 0x38f   : > { %1887 = vmatprep.subr.bf16.mxu1 %v2717_v10  ;;  %v2763_v10 = vld [vmem:[#allocation10 + $0x40] sm:$0xff]  }
 0x390   : > { %2437 = vmatprep.subr.bf16.mxu0 %v2763_v10 }
 0x424   : > { %v1062_v56 = vpop.f32.mrb[12].mxu1 }
 0x425   : > { %v1064_v57 = vpop.f32.mrb[13].mxu1 }
 0x426   : > { %v1066_v58 = vpop.f32.mrb[14].mxu1 }
 0x427   : > { %v1081_v59 = vpack.c.bf16 %v1066_v58, %v1062_v56  ;;  %v1068_v60 = vpop.f32.mrb[15].mxu1 }
 0x428   : > { %v1082_v61 = vpack.c.bf16 %v1068_v60, %v1064_v57  ;;  %v2742_v60 = vld [vmem:[#allocation8 + $0x90] ss:$8 sps:$4 sm:$0xff]  }
 0x42a   : > { %1321 = vmatprep.mubr.bf16.mxu1 %v1082_v61  ;;  %v2747_v61 = vld [vmem:[#allocation8 + $0xa4] ss:$8 sps:$4 sm:$0xff]  }
 0x42b   : > { %1322 = vmatmul.mubr.bf16.vlgmr.msra.gmra.mrb[20].mxu1 %v1081_v59  ;;  %v2744_v59 = vld [vmem:[#allocation8 + $0x94] ss:$8 sps:$4 sm:$0xff]  }
 0x42c   : > { %v1072_v62 = vpop.f32.mrb[16].mxu1  ;;  %1888 = vmatpush1.bf16.msra.mxu1 %v2715_v8  ;;  %v2762_v8 = vld [vmem:[#allocation8 + $0xf4] ss:$8 sps:$4 sm:$0xff]  }
 0x42d   : > { %v1074_v63 = vpop.f32.mrb[17].mxu1  ;;  %1889 = vmatprep.subr.bf16.mxu1 %v2720_v3  ;;  %v2764_v3 = vld [vmem:[#allocation10] sm:$0xff]  }
 0x42e   : > { %v1076_v0 = vpop.f32.mrb[18].mxu1 }
 0x42f   : > { %v1083_v1 = vpack.c.bf16 %v1076_v0, %v1072_v62  ;;  %v1078_v4 = vpop.f32.mrb[19].mxu1  ;;  %v2745_v62 = vld [vmem:[#allocation8 + $0xa0] ss:$8 sps:$4 sm:$0xff]   ;;  %v2748_v0 = vld [vmem:[#allocation8 + $0xb0] ss:$8 sps:$4 sm:$0xff]  }
 0x430   : > { %v1084_v5 = vpack.c.bf16 %v1078_v4, %v1074_v63  ;;  %1890 = vmatpush1.bf16.msra.mxu1 %v2718_v11  ;;  %v2750_v63 = vld [vmem:[#allocation8 + $0xb4] ss:$8 sps:$4 sm:$0xff]   ;;  %v2751_v4 = vld [vmem:[#allocation8 + $0xc0] ss:$8 sps:$4 sm:$0xff]  }
 0x431   : > { %1891 = vmatprep.subr.bf16.mxu1 %v2723_v12  ;;  %v2765_v11 = vld [vmem:[#allocation10 + $0x48] sm:$0xff]  }
 0x432   : > { %1331 = vmatprep.mubr.bf16.mxu1 %v1084_v5  ;;  %v2756_v5 = vld [vmem:[#allocation8 + $0xd4] ss:$8 sps:$4 sm:$0xff]   ;;  %v2766_v12 = vld [vmem:[#allocation10 + $0x8] sm:$0xff]  }
 0x433   : > { %1332 = vmatmul.mubr.bf16.gmra.mrb[24].mxu1 %v1083_v1  ;;  %v2753_v1 = vld [vmem:[#allocation8 + $0xc4] ss:$8 sps:$4 sm:$0xff]  }
 0x434   : > { %1892 = vmatpush1.bf16.msra.mxu1 %v2721_v13  ;;  %v2767_v13 = vld [vmem:[#allocation10 + $0x50] sm:$0xff]  }
 0x435   : > { %1893 = vmatprep.subr.bf16.mxu1 %v2726_v14  ;;  %v2768_v14 = vld [vmem:[#allocation10 + $0x10] sm:$0xff]  }
 0x438   : > { %1894 = vmatpush1.bf16.msra.mxu1 %v2724_v15  ;;  %v2769_v15 = vld [vmem:[#allocation10 + $0x58] sm:$0xff]  }
 0x439   : > { %1895 = vmatprep.subr.bf16.mxu1 %v2729_v16  ;;  %v2770_v16 = vld [vmem:[#allocation10 + $0x18] sm:$0xff]  }
 0x43c   : > { %1896 = vmatpush1.bf16.msra.mxu1 %v2727_v17  ;;  %v2771_v17 = vld [vmem:[#allocation10 + $0x60] sm:$0xff]  }
 0x43d   : > { %1897 = vmatprep.subr.bf16.mxu1 %v2732_v18  ;;  %v2772_v18 = vld [vmem:[#allocation10 + $0x20] sm:$0xff]  }
 0x440   : > { %1898 = vmatpush1.bf16.msra.mxu1 %v2730_v19  ;;  %v2773_v19 = vld [vmem:[#allocation10 + $0x68] sm:$0xff]  }
 0x441   : > { %1899 = vmatprep.subr.bf16.mxu1 %v2735_v20  ;;  %v2774_v20 = vld [vmem:[#allocation10 + $0x28] sm:$0xff]  }
 0x444   : > { %1900 = vmatpush1.bf16.msra.mxu1 %v2733_v21  ;;  %v1386_v21 = vld [vmem:[%s3403_s9] sm:$0x3] }
 0x445   : > { %1901 = vmatprep.subr.bf16.mxu1 %v2738_v22  ;;  %v1391_v22 = vrot.slane %v1386_v21, %v3310_v53 }
 0x448   : > { %1902 = vmatpush1.bf16.msra.mxu1 %v2736_v23  ;;  %v1395_v23 = vrot.slane %v1386_v21, %v3315_v55 }
 0x449   : > { %1903 = vmatprep.subr.bf16.mxu1 %v2741_v24 }
 0x44c   : > { %1904 = vmatpush1.bf16.msra.mxu1 %v2739_v25 }
 0x44d   : > { %1905 = vmatprep.subr.bf16.mxu1 %v2744_v59 }
 0x450   : > { %1906 = vmatpush1.bf16.msra.mxu1 %v2742_v60 }
 0x451   : > { %1907 = vmatprep.subr.bf16.mxu1 %v2747_v61 }
 0x454   : > { %1908 = vmatpush1.bf16.msra.mxu1 %v2745_v62 }
 0x455   : > { %1909 = vmatprep.subr.bf16.mxu1 %v2750_v63 }
 0x458   : > { %1910 = vmatpush1.bf16.msra.mxu1 %v2748_v0 }
 0x459   : > { %1911 = vmatprep.subr.bf16.mxu1 %v2753_v1 }
 0x45c   : > { %1912 = vmatpush1.bf16.msra.mxu1 %v2751_v4 }
 0x45d   : > { %1913 = vmatprep.subr.bf16.mxu1 %v2756_v5 }
 0x460   : > { %1914 = vmatpush1.bf16.msra.mxu1 %v2754_v2 }
 0x461   : > { %1915 = vmatprep.subr.bf16.mxu1 %v2759_v9 }
 0x464   : > { %1916 = vmatpush1.bf16.msra.mxu1 %v2757_v6 }
 0x465   : > { %1917 = vmatprep.subr.bf16.mxu1 %v2762_v8 }
 0x468   : > { %1918 = vmatpush1.bf16.msra.mxu1 %v2760_v7 }
 0x4fe   : > { %v1323_v29 = vpop.f32.mrb[20].mxu1 }
 0x4ff   : > { %v1324_v30 = vadd.f32 %v1323_v29, %v1122_v27  ;;  %v1325_v31 = vpop.f32.mrb[21].mxu1 }
 0x500   : > { %v1326_v32 = vadd.f32 %v1325_v31, %v1126_v28  ;;  %v1327_v33 = vpop.f32.mrb[22].mxu1 }
 0x501   : > { %v1328_v34 = vadd.f32 %v1327_v33, %v1122_v27  ;;  %v1329_v35 = vpop.f32.mrb[23].mxu1  ;;  %v1342_v37 = vmax.f32 %v1324_v30, 0.0 }
 0x502   : > { %v1330_v36 = vadd.f32 %v1329_v35, %v1126_v28  ;;  %v1343_v39 = vmax.f32 %v1326_v32, 0.0 }
 0x503   : > { %v1344_v38 = vmax.f32 %v1328_v34, 0.0 }
 0x504   : > { %v1345_v40 = vmax.f32 %v1330_v36, 0.0 }
 0x505   : > { %v1350_v41 = vpack.c.bf16 %v1344_v38, %v1342_v37 }
 0x506   : > { %v1351_v42 = vpack.c.bf16 %v1345_v40, %v1343_v39  ;;  %v1333_v43 = vpop.f32.mrb[24].mxu1 }
 0x507   : > { %v1334_v44 = vadd.f32 %v1333_v43, %v1122_v27  ;;  %v1335_v45 = vpop.f32.mrb[25].mxu1 }
 0x508   : > { %v1336_v46 = vadd.f32 %v1335_v45, %v1126_v28  ;;  %v1337_v47 = vpop.f32.mrb[26].mxu1  ;;  %1590 = vmatprep.mubr.bf16.mxu0 %v1351_v42 }
 0x509   : > { %v1338_v48 = vadd.f32 %v1337_v47, %v1122_v27  ;;  %v1339_v49 = vpop.f32.mrb[27].mxu1  ;;  %1591 = vmatmul.mubr.bf16.vlgmr.msra.gmra.mrb[8].mxu0 %v1350_v41  ;;  %v1346_v51 = vmax.f32 %v1334_v44, 0.0 }
 0x50a   : > { %v1340_v50 = vadd.f32 %v1339_v49, %v1126_v28  ;;  %v1347_v54 = vmax.f32 %v1336_v46, 0.0  ;;  %2438 = vmatpush3.bf16.msra.mxu0 %v2764_v3 }
 0x50b   : > { %v1348_v52 = vmax.f32 %v1338_v48, 0.0  ;;  %2439 = vmatprep.subr.bf16.mxu0 %v2765_v11 }
 0x50c   : > { %v1349_v56 = vmax.f32 %v1340_v50, 0.0 }
 0x50d   : > { %v1352_v57 = vpack.c.bf16 %v1348_v52, %v1346_v51 }
 0x50e   : > { %v1353_v58 = vpack.c.bf16 %v1349_v56, %v1347_v54  ;;  %2440 = vmatpush3.bf16.msra.mxu0 %v2766_v12 }
 0x50f   : > { %2441 = vmatprep.subr.bf16.mxu0 %v2767_v13 }
 0x510   : > { %1600 = vmatprep.mubr.bf16.mxu0 %v1353_v58 }
 0x511   : > { %1601 = vmatmul.mubr.bf16.gmra.mrb[12].mxu0 %v1352_v57 }
 0x512   : > { %2442 = vmatpush3.bf16.msra.mxu0 %v2768_v14 }
 0x513   : > { %2443 = vmatprep.subr.bf16.mxu0 %v2769_v15 }
 0x516   : > { %2444 = vmatpush3.bf16.msra.mxu0 %v2770_v16 }
 0x517   : > { %2445 = vmatprep.subr.bf16.mxu0 %v2771_v17 }
 0x51a   : > { %2446 = vmatpush3.bf16.msra.mxu0 %v2772_v18 }
 0x51b   : > { %2447 = vmatprep.subr.bf16.mxu0 %v2773_v19 }
 0x51e   : > { %2448 = vmatpush3.bf16.msra.mxu0 %v2774_v20 }
 0x5dc   : > { %v1592_v24 = vpop.f32.mrb[8].mxu0 }
 0x5dd   : > { %v1593_v25 = vadd.f32 %v1592_v24, %v1391_v22  ;;  %v1594_v26 = vpop.f32.mrb[9].mxu0 }
 0x5de   : > { %v1595_v27 = vadd.f32 %v1594_v26, %v1395_v23  ;;  %v1596_v28 = vpop.f32.mrb[10].mxu0 }
 0x5df   : > { %v1611_v29 = vrot.slane %v1593_v25, 4  ;;  %v1597_v30 = vadd.f32 %v1596_v28, %v1391_v22  ;;  %v1598_v31 = vpop.f32.mrb[11].mxu0 }
 0x5e0   : > { %v1617_v32 = vrot.slane %v1595_v27, 4  ;;  %v1599_v33 = vadd.f32 %v1598_v31, %v1395_v23 }
 0x5e1   : > { %v1612_v34 = vadd.f32 %v1611_v29, %v1593_v25  ;;  %v1623_v35 = vrot.slane %v1597_v30, 4 }
 0x5e2   : > { %v1618_v36 = vadd.f32 %v1617_v32, %v1595_v27  ;;  %v1629_v37 = vrot.slane %v1599_v33, 4 }
 0x5e3   : > { %v1613_v38 = vrot.slane %v1612_v34, 2  ;;  %v1624_v39 = vadd.f32 %v1623_v35, %v1597_v30  ;;  %v2776_v35 = vld [vmem:[#allocation10 + $0x30] sm:$0xff]  }
 0x5e4   : > { %v1619_v40 = vrot.slane %v1618_v36, 2  ;;  %v1630_v41 = vadd.f32 %v1629_v37, %v1599_v33  ;;  %v1602_v42 = vpop.f32.mrb[12].mxu0  ;;  %v2778_v37 = vld [vmem:[#allocation10 + $0x38] sm:$0xff]  }
 0x5e5   : > { %v1614_v43 = vadd.f32 %v1613_v38, %v1612_v34  ;;  %v1625_v44 = vrot.slane %v1624_v39, 2  ;;  %v1603_v45 = vadd.f32 %v1602_v42, %v1391_v22  ;;  %v1604_v46 = vpop.f32.mrb[13].mxu0  ;;  %v2775_v34 = vld [vmem:[#allocation10 + $0x70] sm:$0xff]   ;;  %v1715_v38 = vld [vmem:[%s3405_s11] sm:$0x3] }
 0x5e6   : > { %v1620_v47 = vadd.f32 %v1619_v40, %v1618_v36  ;;  %v1631_v48 = vrot.slane %v1630_v41, 2  ;;  %v1605_v49 = vadd.f32 %v1604_v46, %v1395_v23  ;;  %v1606_v50 = vpop.f32.mrb[14].mxu0  ;;  %2449 = vmatprep.subr.bf16.mxu0 %v2775_v34  ;;  %v2777_v36 = vld [vmem:[#allocation10 + $0x78] sm:$0xff]   ;;  %v1724_v40 = vrot.slane %v1715_v38, %v3315_v55 }
 0x5e7   : > { %v1615_v51 = vrot.slane %v1614_v43, 1  ;;  %v1626_v52 = vadd.f32 %v1625_v44, %v1624_v39  ;;  %v1635_v54 = vrot.slane %v1603_v45, 4  ;;  %v1607_v56 = vadd.f32 %v1606_v50, %v1391_v22  ;;  %v1608_v57 = vpop.f32.mrb[15].mxu0  ;;  %2450 = vmatpush3.bf16.msra.mxu0 %v2776_v35 }
 0x5e8   : > { %v1621_v58 = vrot.slane %v1620_v47, 1  ;;  %v1632_v59 = vadd.f32 %v1631_v48, %v1630_v41  ;;  %v1641_v60 = vrot.slane %v1605_v49, 4  ;;  %v1609_v61 = vadd.f32 %v1608_v57, %v1395_v23  ;;  %2451 = vmatprep.subr.bf16.mxu0 %v2777_v36 }
 0x5e9   : > { %v1627_v62 = vrot.slane %v1626_v52, 1  ;;  %v1636_v63 = vadd.f32 %v1635_v54, %v1603_v45  ;;  %v1647_v0 = vrot.slane %v1607_v56, 4  ;;  %v1616_v2 = vadd.f32 %v1615_v51, %v1614_v43 }
 0x5ea   : > { %v1633_v1 = vrot.slane %v1632_v59, 1  ;;  %v1642_v4 = vadd.f32 %v1641_v60, %v1605_v49  ;;  %v1653_v5 = vrot.slane %v1609_v61, 4  ;;  %v1622_v8 = vadd.f32 %v1621_v58, %v1620_v47 }
 0x5eb   : > { %v1628_v9 = vadd.f32 %v1627_v62, %v1626_v52  ;;  %v1637_v6 = vrot.slane %v1636_v63, 2  ;;  %v1648_v7 = vadd.f32 %v1647_v0, %v1607_v56  ;;  %2452 = vmatpush3.bf16.msra.mxu0 %v2778_v37  ;;  %v1720_v39 = vrot.slane %v1715_v38, %v3310_v53  ;;  %v2410_v53 = vld [vmem:[%s3447_s29] ss:$0 sm:$0xff] }
 0x5ec   : > { %v1634_v10 = vadd.f32 %v1633_v1, %v1632_v59  ;;  %v1643_v3 = vrot.slane %v1642_v4, 2  ;;  %v1654_v11 = vadd.f32 %v1653_v5, %v1609_v61 }
 0x5ed   : > { %v1668_v12 = vsel %vm1667_vm3, %v1628_v9, %v1616_v2  ;;  %v1638_v13 = vadd.f32 %v1637_v6, %v1636_v63  ;;  %v1649_v14 = vrot.slane %v1648_v7, 2 }
 0x5ee   : > { %v1673_v15 = vsel %vm1667_vm3, %v1634_v10, %v1622_v8  ;;  %v1644_v16 = vadd.f32 %v1643_v3, %v1642_v4  ;;  %v1655_v17 = vrot.slane %v1654_v11, 2 }
 0x5ef   : > { %v1639_v18 = vrot.slane %v1638_v13, 1  ;;  %v1650_v19 = vadd.f32 %v1649_v14, %v1648_v7 }
 0x5f0   : > { %v1645_v20 = vrot.slane %v1644_v16, 1  ;;  %v1656_v21 = vadd.f32 %v1655_v17, %v1654_v11 }
 0x5f1   : > { %v1640_v22 = vadd.f32 %v1639_v18, %v1638_v13  ;;  %v1651_v23 = vrot.slane %v1650_v19, 1 }
 0x5f2   : > { %v1646_v24 = vadd.f32 %v1645_v20, %v1644_v16  ;;  %v1657_v25 = vrot.slane %v1656_v21, 1 }
 0x5f3   : > { %v1670_v26 = vsel %vm1669_vm4, %v1640_v22, %v1668_v12  ;;  %v1652_v27 = vadd.f32 %v1651_v23, %v1650_v19 }
 0x5f4   : > { %v1658_v28 = vadd.f32 %v1657_v25, %v1656_v21  ;;  %v1674_v29 = vsel %vm1669_vm4, %v1646_v24, %v1673_v15 }
 0x5f5   : > { %v1672_v30 = vsel %vm1671_vm5, %v1652_v27, %v1670_v26 }
 0x5f6   : > { %v1675_v31 = vsel %vm1671_vm5, %v1658_v28, %v1674_v29  ;;  %v2408_v33 = vpack.c.bf16 %v1672_v30, %v1672_v30 }
 0x5f7   : > { %v2405_v32 = vpack.c.bf16 %v1675_v31, %v1675_v31 }
 0x5f9   : > { %2406 = vmatprep.mubr.msk.bf16.mxu1 %vm2404_vm7, %v2405_v32 }
 0x5fa   : > { %2409 = vmatmul.mubr.msk.bf16.vlgmr.msra.gmra.mrb[28].mxu1 %vm2404_vm7, %v2408_v33 }
 0x6cd   : > { %v1921_v41 = vpop.f32.mrb[28].mxu1 }
 0x6ce   : > { %v1922_v42 = vadd.f32 %v1921_v41, %v1720_v39  ;;  %v1923_v43 = vpop.f32.mrb[29].mxu1 }
 0x6cf   : > { %v1924_v44 = vadd.f32 %v1923_v43, %v1724_v40  ;;  %v1925_v45 = vpop.f32.mrb[30].mxu1 }
 0x6d0   : > { %v1928_v46 = vmax.f32 %v1922_v42, 0.0  ;;  %v1926_v47 = vpop.f32.mrb[31].mxu1 }
 0x6d1   : > { %v1929_v48 = vmax.f32 %v1924_v44, 0.0 }
 0x6d2   : > { %v1930_v50 = vpack.c.bf16 %v1928_v46, %v1928_v46 }
 0x6d3   : > { %v1931_v49 = vpack.c.bf16 %v1929_v48, %v1929_v48 }
 0x6d5   : > { %2099 = vmatprep.mubr.bf16.mxu0 %v1931_v49 }
 0x6d6   : > { %2100 = vmatmul.mubr.bf16.vlgmr.msra.gmra.mrb[16].mxu0 %v1930_v50 }
 0x7a9   : > { %v2453_v51 = vpop.f32.mrb[16].mxu0 }
 0x7aa   : > { %v2454_v55 = vpop.f32.mrb[17].mxu0 }
 0x7ab   : > { %v2455_v52 = vadd.f32 %v2454_v55, %v2453_v51  ;;  %v2456_v54 = vpop.f32.mrb[18].mxu0 }
 0x7ac   : > { %v2457_v56 = vpop.f32.mrb[19].mxu0 }
 0x7ad   : > { %v2102_v57 = vadd.f32 %v2455_v52, %v2410_v53 }
 0x7af   : > { %2107 = vst [vmem:[%s548_s15] sm:$0xff] %v2102_v57 }
 0x7b0   : > { %2932 = shalt.err (!%p2929_p10)
}
 0x7b1   : > { %s2933_s23 = scalar_lea.hbm %s3352_s28, 128  ;;  %s2937_s21 = scalar_lea.hbm %s3450_s25, 1024 }
 0x7b2   : > { %p2934_p0 = scmp.ne.s32.totalorder %s3352_s28, %s2933_s23  ;;  %p2938_p4 = scmp.lt.u32.totalorder %s3352_s28, %s3450_s25 }
 0x7b3   : > { %p2939_p12 = scmp.lt.u32.totalorder %s2937_s21, %s2933_s23  ;;  %p2941_p8 = scmp.lt.u32.totalorder %s2933_s23, %s3352_s28 }
 0x7b4   : > { %p2935_p2 = pnand %p2934_p0, %p3451_p11 }
 0x7b5   : > { %p2940_p7 = por %p2939_p12, %p2938_p4 }
 0x7b6   : > { %p2936_p3 = pneg %p2935_p2 }
 0x7b7   : > { %p2942_p13 = por %p2941_p8, %p2940_p7 }
 0x7b9   : > { %p2943_p1 = pnand %p2942_p13, %p2936_p3 }
 0x7bb   : > { %2946 = shalt.err (!%p2943_p1)
}
 0x7bc   : > { %2487 = dma.vmem_to_hbm [thread:$0]  (%p3451_p11), %s3354_s19, 128, %s3352_s28, %s2109_s24  }
 0x7bd PF: > { %s3452_s15 = sld [smem:[#allocation19_spill]]  ;;  %s3453_s30 = sld [smem:[#allocation16_spill]] }
 0x7be   : > { %s3454_s22 = sld [smem:[#allocation23_spill]] }
 0x7c3   : > { %p2519_p6 = scmp.ge.s32.totalorder %s3452_s15, 2  ;;  %s2134_s16 = sand.u32 1, %s3453_s30  }
 0x7c4   : > { %p3455_p9 = scmp.ne.s32.totalorder %s3454_s22, 0  ;;  %s2135_s6 = scalar_lea.sflag [#allocation4], %s2134_s16 }
 0x7c6   : > { %p2506_p5 = pnand %p2519_p6, %p3455_p9 }
 0x7c8   : > { %2976 = dma.done.wait (!%p2506_p5), %s2135_s6, 128  }
 0x7c9   : > { %2978 = vsyncadd (!%p2506_p5), %s2135_s6, 4294967168  ;;  %s3456_s16 = sld [smem:[#allocation20_spill]]  ;;  %s3457_s29 = sld [smem:[#allocation17_spill]] }
 0x7ca   : > { %s3458_s30 = sld [smem:[#allocation18_spill]]  ;;  %s3459_s15 = sld [smem:[#allocation21_spill]] }
 0x7cf   : > { %p27_p10 = scmp.ge.s32.totalorder %s3456_s16, 10  }
 0x7d1   :  { %29 = sbr.rel (!%p27_p10) target bundleno = 10 (0xa), region = 135 }
 0x7d8   :  { %2140 = vsyncpa [#allocation3], 1 }
 0x7d9   :  { %2142 = vsyncpa [#allocation3 + $0x1], 1 }
 0x7da   :  { %2143 = vsyncpa [#allocation6], 1 }
 0x7db   :  { %2144 = vsyncpa [#allocation9], 1 }
 0x7dc   :  { %2145 = vsyncpa [#allocation4], 1 }
 0x7dd   :  { %2147 = vsyncpa [#allocation4 + $0x1], 1 }

</bundles_post_ra>
